<compile_context>
chip_gen: v7x
topology: tpu7x:2x2x1
jax: 0.10.0
libtpu: 0.0.40
codegen_flags: <defaults>
</compile_context>

<pallas_src>
import functools

import jax
import jax.numpy as jnp
from jax import lax
from jax.experimental import pallas as pl
from jax.experimental.pallas import tpu as pltpu


def _flash_self_attention_kernel(
    # inputs
    x_q_ref,      # (1, tq, D)   x tile for the current q block
    x_kv_ref,     # (1, tk, D)   x tile for the current kv block
    wq_ref,       # (D, dk)
    wk_ref,       # (D, dk)
    wv_ref,       # (D, dv)
    # output
    o_ref,        # (1, tq, dv)
    # scratch
    q_tile_ref,   # (tq, dk)  cached (scaled) Q for this q tile
    k_cache_ref,  # (N, dk)   per-batch K cache
    v_cache_ref,  # (N, dv)   per-batch V cache
    m_ref,        # (tq, 1)   running max       (f32)
    l_ref,        # (tq, 1)   running sum-exp   (f32)
    acc_ref,      # (tq, dv)  running output    (f32)
    *, scale, block_kv,
):
    qi = pl.program_id(1)
    ki = pl.program_id(2)
    nk = pl.num_programs(2)

    # ---- K/V projection, hoisted: once per (batch, kv-tile), on the first q sweep ----
    @pl.when(qi == 0)
    def _fill_kv_cache():
        x_kv = x_kv_ref[0]                                                   # (tk, D)
        k_t = jnp.dot(x_kv, wk_ref[...], preferred_element_type=jnp.float32)
        v_t = jnp.dot(x_kv, wv_ref[...], preferred_element_type=jnp.float32)
        off = pl.multiple_of(ki * block_kv, block_kv)
        k_cache_ref[pl.ds(off, block_kv), :] = k_t.astype(k_cache_ref.dtype)
        v_cache_ref[pl.ds(off, block_kv), :] = v_t.astype(v_cache_ref.dtype)

    # ---- Q projection (scale folded in) + accumulator init: once per q tile ----
    @pl.when(ki == 0)
    def _init_q_and_acc():
        x_q = x_q_ref[0]                                                     # (tq, D)
        q = jnp.dot(x_q, wq_ref[...], preferred_element_type=jnp.float32) * scale
        q_tile_ref[...] = q.astype(q_tile_ref.dtype)
        m_ref[...] = jnp.full_like(m_ref, -jnp.inf)
        l_ref[...] = jnp.zeros_like(l_ref)
        acc_ref[...] = jnp.zeros_like(acc_ref)

    # ---- Online-softmax update for this (q-tile, kv-tile) pair ----
    off = pl.multiple_of(ki * block_kv, block_kv)
    k_t = k_cache_ref[pl.ds(off, block_kv), :]                               # (tk, dk)
    v_t = v_cache_ref[pl.ds(off, block_kv), :]                               # (tk, dv)

    # NT matmul: contract the dk axis of both Q and K (no explicit transpose / XLU pass).
    s = lax.dot_general(
        q_tile_ref[...], k_t,
        dimension_numbers=(((1,), (1,)), ((), ())),
        preferred_element_type=jnp.float32)                                  # (tq, tk)

    m_prev = m_ref[...]
    m_new = jnp.maximum(m_prev, jnp.max(s, axis=-1, keepdims=True))
    alpha = jnp.exp(m_prev - m_new)
    p = jnp.exp(s - m_new)                                                   # f32 probs
    l_ref[...] = alpha * l_ref[...] + jnp.sum(p, axis=-1, keepdims=True)
    acc_ref[...] = alpha * acc_ref[...] + jnp.dot(
        p.astype(v_t.dtype), v_t, preferred_element_type=jnp.float32)
    m_ref[...] = m_new

    # ---- Finalize: normalize and emit the output tile ----
    @pl.when(ki == nk - 1)
    def _finalize():
        inv_l = pl.reciprocal(l_ref[...], approx=True)                       # EUP slot
        o_ref[0] = (acc_ref[...] * inv_l).astype(o_ref.dtype)


def _pick_block(n, preferred):
    """Largest tile <= preferred that divides n and is 8-aligned, else the full dim."""
    if n <= preferred:
        return n
    t = preferred
    while t >= 8:
        if n % t == 0 and t % 8 == 0:
            return t
        t //= 2
    return n


def self_attention(x, w_q, w_k, w_v, *, block_q=256, block_kv=256):
    """x: (B, N, D); w_q/w_k: (D, dk); w_v: (D, dv). Returns (B, N, dv).

    block_q/block_kv defaults target v6e/v7x (256-aligned MXU pushes); pass 128 on v5e.
    """
    B, N, D = x.shape
    dk = w_q.shape[1]
    dv = w_v.shape[1]
    scale = 1.0 / float(dk) ** 0.5

    tq = _pick_block(N, block_q)
    tk = _pick_block(N, block_kv)
    nq = N // tq
    nk = N // tk

    # K/V/Q caches inherit the input dtype: bf16 inputs -> bf16 MXU operands
    # (f32 accumulation is preserved via preferred_element_type inside the kernel).
    cache_dtype = x.dtype

    kernel = functools.partial(
        _flash_self_attention_kernel, scale=scale, block_kv=tk)

    itemsize = x.dtype.itemsize
    flops = 2 * B * N * D * (2 * dk + dv) + 2 * B * N * N * (dk + dv)
    transcendentals = B * N * N
    bytes_accessed = (2 * B * N * D * itemsize            # x (read via two specs)
                      + (2 * D * dk + D * dv) * w_q.dtype.itemsize
                      + B * N * dv * itemsize)            # output

    return pl.pallas_call(
        kernel,
        out_shape=jax.ShapeDtypeStruct((B, N, dv), x.dtype),
        grid_spec=pltpu.PrefetchScalarGridSpec(
            num_scalar_prefetch=0,
            grid=(B, nq, nk),
            in_specs=[
                pl.BlockSpec((1, tq, D), lambda b, qi, ki: (b, qi, 0)),  # x for Q tile
                pl.BlockSpec((1, tk, D), lambda b, qi, ki: (b, ki, 0)),  # x for K/V tile
                pl.BlockSpec((D, dk), lambda b, qi, ki: (0, 0)),         # W_q (whole)
                pl.BlockSpec((D, dk), lambda b, qi, ki: (0, 0)),         # W_k (whole)
                pl.BlockSpec((D, dv), lambda b, qi, ki: (0, 0)),         # W_v (whole)
            ],
            out_specs=pl.BlockSpec((1, tq, dv), lambda b, qi, ki: (b, qi, 0)),
            scratch_shapes=[
                pltpu.VMEM((tq, dk), cache_dtype),   # cached scaled Q tile
                pltpu.VMEM((N, dk), cache_dtype),    # per-batch K cache
                pltpu.VMEM((N, dv), cache_dtype),    # per-batch V cache
                pltpu.VMEM((tq, 1), jnp.float32),    # running max  m
                pltpu.VMEM((tq, 1), jnp.float32),    # running sum  l
                pltpu.VMEM((tq, dv), jnp.float32),   # output accumulator
            ],
        ),
        compiler_params=pltpu.CompilerParams(
            # batch axis parallel (megacore); q-tile kept "arbitrary" because the
            # per-batch K/V cache is filled during the qi==0 sweep and must stay
            # on a single core; kv-tile is the online-softmax reduction axis.
            dimension_semantics=("parallel", "arbitrary", "arbitrary"),
            vmem_limit_bytes=48 * 1024 * 1024,   # headroom below v7x's 64 MiB physical
        ),
        cost_estimate=pl.CostEstimate(
            flops=flops,
            transcendentals=transcendentals,
            bytes_accessed=bytes_accessed),
    )(x, x, w_q, w_k, w_v)


def self_attention_ref(x, w_q, w_k, w_v):
    dk = w_q.shape[1]
    q = jnp.einsum("bnd,dk->bnk", x, w_q)
    k = jnp.einsum("bnd,dk->bnk", x, w_k)
    v = jnp.einsum("bnd,dv->bnv", x, w_v)
    scores = jnp.einsum("bqk,bsk->bqs", q, k) / jnp.sqrt(jnp.float32(dk))
    atten = jax.nn.softmax(scores, axis=-1)
    return jnp.einsum("bqs,bsv->bqv", atten, v)


if __name__ == "__main__":
    key = jax.random.PRNGKey(0)
    kx, kq, kk, kv, kx2 = jax.random.split(key, 5)

    # Lane-aligned small shapes: dk/dv multiples of 128, seq split into multiple
    # q/kv tiles so the online-softmax + K/V-cache paths are exercised.
    B, N, D = 2, 256, 128
    dim_k, dim_v = 128, 128    # defaults to input_vector_dim in the torch module

    x = jax.random.normal(kx, (B, N, D), dtype=jnp.float32)
    # deterministic synthetic weights (equivalent to nn.Linear(..., bias=False).weight.T)
    w_q = jax.random.normal(kq, (D, dim_k), dtype=jnp.float32) * (1.0 / D ** 0.5)
    w_k = jax.random.normal(kk, (D, dim_k), dtype=jnp.float32) * (1.0 / D ** 0.5)
    w_v = jax.random.normal(kv, (D, dim_v), dtype=jnp.float32) * (1.0 / D ** 0.5)

    # Multi-tile path: 128-sized q/kv tiles -> grid (B, 2, 2).
    out = self_attention(x, w_q, w_k, w_v, block_q=128, block_kv=128)
    jax.block_until_ready(out)
    ref = self_attention_ref(x, w_q, w_k, w_v)
    assert out.shape == (B, N, dim_v)
    # approx reciprocal + reassociated online softmax -> slightly looser tolerance
    assert jnp.allclose(out, ref, atol=1e-2, rtol=1e-2), "mismatch vs reference (tiled)"

    # Single-tile fallback path (seq shorter than the default block).
    x2 = jax.random.normal(kx2, (B, 64, D), dtype=jnp.float32)
    out2 = self_attention(x2, w_q, w_k, w_v)
    jax.block_until_ready(out2)
    ref2 = self_attention_ref(x2, w_q, w_k, w_v)
    assert jnp.allclose(out2, ref2, atol=1e-2, rtol=1e-2), "mismatch vs reference (single tile)"

    print("KERNEL_OK")
</pallas_src>

<mosaic_0001>
module attributes {stable_mosaic.version = 11 : i64} {
  func.func @_flash_self_attention_kernel(%arg0: i32, %arg1: i32, %arg2: i32, %arg3: memref<1x128x128xf32, #tpu.memory_space<vmem>>, %arg4: memref<1x128x128xf32, #tpu.memory_space<vmem>>, %arg5: memref<128x128xf32, #tpu.memory_space<vmem>>, %arg6: memref<128x128xf32, #tpu.memory_space<vmem>>, %arg7: memref<128x128xf32, #tpu.memory_space<vmem>>, %arg8: memref<1x128x128xf32, #tpu.memory_space<vmem>>, %arg9: memref<128x128xf32, #tpu.memory_space<vmem>>, %arg10: memref<256x128xf32, #tpu.memory_space<vmem>>, %arg11: memref<256x128xf32, #tpu.memory_space<vmem>>, %arg12: memref<128x1xf32, #tpu.memory_space<vmem>>, %arg13: memref<128x1xf32, #tpu.memory_space<vmem>>, %arg14: memref<128x128xf32, #tpu.memory_space<vmem>>) attributes {dimension_semantics = [#tpu.dimension_semantics<parallel>, #tpu.dimension_semantics<arbitrary>, #tpu.dimension_semantics<arbitrary>], iteration_bounds = array<i64: 2, 2, 2>, scalar_prefetch = 0 : i64, scratch_operands = 6 : i64, tpu.core_type = #tpu.core_type<tc>, window_params = [{transform_indices = @transform_0, window_bounds = array<i64: 1, 128, 128>}, {transform_indices = @transform_1, window_bounds = array<i64: 1, 128, 128>}, {pipeline_mode = #tpu.pipeline_mode<synchronous>, transform_indices = @transform_2, window_bounds = array<i64: 128, 128>}, {pipeline_mode = #tpu.pipeline_mode<synchronous>, transform_indices = @transform_3, window_bounds = array<i64: 128, 128>}, {pipeline_mode = #tpu.pipeline_mode<synchronous>, transform_indices = @transform_4, window_bounds = array<i64: 128, 128>}, {transform_indices = @transform_5, window_bounds = array<i64: 1, 128, 128>}]} {
    %c0_i32 = arith.constant 0 : i32
    %0 = arith.cmpi eq, %arg1, %c0_i32 : i32
    %1 = arith.extui %0 : i1 to i32
    %c0_i32_0 = arith.constant 0 : i32
    %2 = arith.cmpi ne, %1, %c0_i32_0 : i32
    scf.if %2 {
      %c0_22 = arith.constant 0 : index
      %c0_23 = arith.constant 0 : index
      %c0_24 = arith.constant 0 : index
      %39 = vector.load %arg4[%c0_22, %c0_23, %c0_24] : memref<1x128x128xf32, #tpu.memory_space<vmem>>, vector<1x128x128xf32>
      %40 = vector.shape_cast %39 : vector<1x128x128xf32> to vector<128x128xf32>
      %c0_25 = arith.constant 0 : index
      %c0_26 = arith.constant 0 : index
      %41 = vector.load %arg6[%c0_25, %c0_26] : memref<128x128xf32, #tpu.memory_space<vmem>>, vector<128x128xf32>
      %cst_27 = arith.constant dense<0.000000e+00> : vector<128x128xf32>
      %42 = tpu.matmul %40, %41, %cst_27 {dimension_numbers = #tpu.dot_dimension_numbers<[1], [0], [0], [1], [0, 0, 1, 1], [], []>} : vector<128x128xf32>, vector<128x128xf32>, vector<128x128xf32> -> vector<128x128xf32>
      %c0_28 = arith.constant 0 : index
      %c0_29 = arith.constant 0 : index
      %43 = vector.load %arg7[%c0_28, %c0_29] : memref<128x128xf32, #tpu.memory_space<vmem>>, vector<128x128xf32>
      %cst_30 = arith.constant dense<0.000000e+00> : vector<128x128xf32>
      %44 = tpu.matmul %40, %43, %cst_30 {dimension_numbers = #tpu.dot_dimension_numbers<[1], [0], [0], [1], [0, 0, 1, 1], [], []>} : vector<128x128xf32>, vector<128x128xf32>, vector<128x128xf32> -> vector<128x128xf32>
      %c128_i32_31 = arith.constant 128 : i32
      %45 = arith.muli %arg2, %c128_i32_31 : i32
      %46 = tpu.assume_multiple %45, 128 : i32
      %47 = arith.index_cast %46 : i32 to index
      %c0_32 = arith.constant 0 : index
      %48 = vector.load %arg10[%47, %c0_32] : memref<256x128xf32, #tpu.memory_space<vmem>>, vector<128x128xf32>
      tpu.vector_store %arg10[%47, %c0_32], %42 {strides = array<i32>} : memref<256x128xf32, #tpu.memory_space<vmem>>, vector<128x128xf32>,
      %49 = arith.index_cast %46 : i32 to index
      %c0_33 = arith.constant 0 : index
      %50 = vector.load %arg11[%49, %c0_33] : memref<256x128xf32, #tpu.memory_space<vmem>>, vector<128x128xf32>
      tpu.vector_store %arg11[%49, %c0_33], %44 {strides = array<i32>} : memref<256x128xf32, #tpu.memory_space<vmem>>, vector<128x128xf32>,
    } else {
    }
    %c0_i32_1 = arith.constant 0 : i32
    %3 = arith.cmpi eq, %arg2, %c0_i32_1 : i32
    %4 = arith.extui %3 : i1 to i32
    %c0_i32_2 = arith.constant 0 : i32
    %5 = arith.cmpi ne, %4, %c0_i32_2 : i32
    scf.if %5 {
      %c0_22 = arith.constant 0 : index
      %c0_23 = arith.constant 0 : index
      %c0_24 = arith.constant 0 : index
      %39 = vector.load %arg3[%c0_22, %c0_23, %c0_24] : memref<1x128x128xf32, #tpu.memory_space<vmem>>, vector<1x128x128xf32>
      %40 = vector.shape_cast %39 : vector<1x128x128xf32> to vector<128x128xf32>
      %c0_25 = arith.constant 0 : index
      %c0_26 = arith.constant 0 : index
      %41 = vector.load %arg5[%c0_25, %c0_26] : memref<128x128xf32, #tpu.memory_space<vmem>>, vector<128x128xf32>
      %cst_27 = arith.constant dense<0.000000e+00> : vector<128x128xf32>
      %42 = tpu.matmul %40, %41, %cst_27 {dimension_numbers = #tpu.dot_dimension_numbers<[1], [0], [0], [1], [0, 0, 1, 1], [], []>} : vector<128x128xf32>, vector<128x128xf32>, vector<128x128xf32> -> vector<128x128xf32>
      %cst_28 = arith.constant 0.0883883461 : f32
      %43 = vector.broadcast %cst_28 : f32 to vector<128x128xf32>
      %44 = arith.mulf %42, %43 : vector<128x128xf32>
      %c0_29 = arith.constant 0 : index
      %c0_30 = arith.constant 0 : index
      %45 = vector.load %arg9[%c0_29, %c0_30] : memref<128x128xf32, #tpu.memory_space<vmem>>, vector<128x128xf32>
      tpu.vector_store %arg9[%c0_29, %c0_30], %44 {strides = array<i32>} : memref<128x128xf32, #tpu.memory_space<vmem>>, vector<128x128xf32>,
      %cst_31 = arith.constant 0xFF800000 : f32
      %46 = vector.broadcast %cst_31 : f32 to vector<128x1xf32>
      %c0_32 = arith.constant 0 : index
      %c0_33 = arith.constant 0 : index
      %47 = vector.load %arg12[%c0_32, %c0_33] : memref<128x1xf32, #tpu.memory_space<vmem>>, vector<128x1xf32>
      tpu.vector_store %arg12[%c0_32, %c0_33], %46 {strides = array<i32>} : memref<128x1xf32, #tpu.memory_space<vmem>>, vector<128x1xf32>,
      %cst_34 = arith.constant 0.000000e+00 : f32
      %48 = vector.broadcast %cst_34 : f32 to vector<128x1xf32>
      %c0_35 = arith.constant 0 : index
      %c0_36 = arith.constant 0 : index
      %49 = vector.load %arg13[%c0_35, %c0_36] : memref<128x1xf32, #tpu.memory_space<vmem>>, vector<128x1xf32>
      tpu.vector_store %arg13[%c0_35, %c0_36], %48 {strides = array<i32>} : memref<128x1xf32, #tpu.memory_space<vmem>>, vector<128x1xf32>,
      %cst_37 = arith.constant 0.000000e+00 : f32
      %50 = vector.broadcast %cst_37 : f32 to vector<128x128xf32>
      %c0_38 = arith.constant 0 : index
      %c0_39 = arith.constant 0 : index
      %51 = vector.load %arg14[%c0_38, %c0_39] : memref<128x128xf32, #tpu.memory_space<vmem>>, vector<128x128xf32>
      tpu.vector_store %arg14[%c0_38, %c0_39], %50 {strides = array<i32>} : memref<128x128xf32, #tpu.memory_space<vmem>>, vector<128x128xf32>,
    } else {
    }
    %c128_i32 = arith.constant 128 : i32
    %6 = arith.muli %arg2, %c128_i32 : i32
    %7 = tpu.assume_multiple %6, 128 : i32
    %8 = arith.index_cast %7 : i32 to index
    %c0 = arith.constant 0 : index
    %9 = vector.load %arg10[%8, %c0] : memref<256x128xf32, #tpu.memory_space<vmem>>, vector<128x128xf32>
    %10 = arith.index_cast %7 : i32 to index
    %c0_3 = arith.constant 0 : index
    %11 = vector.load %arg11[%10, %c0_3] : memref<256x128xf32, #tpu.memory_space<vmem>>, vector<128x128xf32>
    %c0_4 = arith.constant 0 : index
    %c0_5 = arith.constant 0 : index
    %12 = vector.load %arg9[%c0_4, %c0_5] : memref<128x128xf32, #tpu.memory_space<vmem>>, vector<128x128xf32>
    %cst = arith.constant dense<0.000000e+00> : vector<128x128xf32>
    %13 = tpu.matmul %12, %9, %cst {dimension_numbers = #tpu.dot_dimension_numbers<[1], [1], [0], [0], [0, 0, 1, 0], [], []>} : vector<128x128xf32>, vector<128x128xf32>, vector<128x128xf32> -> vector<128x128xf32>
    %c0_6 = arith.constant 0 : index
    %c0_7 = arith.constant 0 : index
    %14 = vector.load %arg12[%c0_6, %c0_7] : memref<128x1xf32, #tpu.memory_space<vmem>>, vector<128x1xf32>
    %cst_8 = arith.constant dense<0xFF800000> : vector<128xf32>
    %15 = vector.multi_reduction <maximumf>, %13, %cst_8 [1] : vector<128x128xf32> to vector<128xf32>
    %16 = vector.shape_cast %15 : vector<128xf32> to vector<128x1xf32>
    %17 = arith.maximumf %14, %16 : vector<128x1xf32>
    %18 = arith.subf %14, %17 : vector<128x1xf32>
    %19 = math.exp %18 : vector<128x1xf32>
    %20 = vector.broadcast %17 : vector<128x1xf32> to vector<128x128xf32>
    %21 = arith.subf %13, %20 : vector<128x128xf32>
    %22 = math.exp %21 : vector<128x128xf32>
    %c0_9 = arith.constant 0 : index
    %c0_10 = arith.constant 0 : index
    %23 = vector.load %arg13[%c0_9, %c0_10] : memref<128x1xf32, #tpu.memory_space<vmem>>, vector<128x1xf32>
    %24 = arith.mulf %19, %23 : vector<128x1xf32>
    %cst_11 = arith.constant dense<0.000000e+00> : vector<128xf32>
    %25 = vector.multi_reduction <add>, %22, %cst_11 [1] : vector<128x128xf32> to vector<128xf32>
    %26 = vector.shape_cast %25 : vector<128xf32> to vector<128x1xf32>
    %27 = arith.addf %24, %26 : vector<128x1xf32>
    %c0_12 = arith.constant 0 : index
    %c0_13 = arith.constant 0 : index
    %28 = vector.load %arg13[%c0_12, %c0_13] : memref<128x1xf32, #tpu.memory_space<vmem>>, vector<128x1xf32>
    tpu.vector_store %arg13[%c0_12, %c0_13], %27 {strides = array<i32>} : memref<128x1xf32, #tpu.memory_space<vmem>>, vector<128x1xf32>,
    %c0_14 = arith.constant 0 : index
    %c0_15 = arith.constant 0 : index
    %29 = vector.load %arg14[%c0_14, %c0_15] : memref<128x128xf32, #tpu.memory_space<vmem>>, vector<128x128xf32>
    %30 = vector.broadcast %19 : vector<128x1xf32> to vector<128x128xf32>
    %31 = arith.mulf %30, %29 : vector<128x128xf32>
    %cst_16 = arith.constant dense<0.000000e+00> : vector<128x128xf32>
    %32 = tpu.matmul %22, %11, %cst_16 {dimension_numbers = #tpu.dot_dimension_numbers<[1], [0], [0], [1], [0, 0, 1, 1], [], []>} : vector<128x128xf32>, vector<128x128xf32>, vector<128x128xf32> -> vector<128x128xf32>
    %33 = arith.addf %31, %32 : vector<128x128xf32>
    %c0_17 = arith.constant 0 : index
    %c0_18 = arith.constant 0 : index
    %34 = vector.load %arg14[%c0_17, %c0_18] : memref<128x128xf32, #tpu.memory_space<vmem>>, vector<128x128xf32>
    tpu.vector_store %arg14[%c0_17, %c0_18], %33 {strides = array<i32>} : memref<128x128xf32, #tpu.memory_space<vmem>>, vector<128x128xf32>,
    %c0_19 = arith.constant 0 : index
    %c0_20 = arith.constant 0 : index
    %35 = vector.load %arg12[%c0_19, %c0_20] : memref<128x1xf32, #tpu.memory_space<vmem>>, vector<128x1xf32>
    tpu.vector_store %arg12[%c0_19, %c0_20], %17 {strides = array<i32>} : memref<128x1xf32, #tpu.memory_space<vmem>>, vector<128x1xf32>,
    %c1_i32 = arith.constant 1 : i32
    %36 = arith.cmpi eq, %arg2, %c1_i32 : i32
    %37 = arith.extui %36 : i1 to i32
    %c0_i32_21 = arith.constant 0 : i32
    %38 = arith.cmpi ne, %37, %c0_i32_21 : i32
    scf.if %38 {
      %c0_22 = arith.constant 0 : index
      %c0_23 = arith.constant 0 : index
      %39 = vector.load %arg13[%c0_22, %c0_23] : memref<128x1xf32, #tpu.memory_space<vmem>>, vector<128x1xf32>
      %40 = tpu.reciprocal %39 {approx = true} : vector<128x1xf32> -> vector<128x1xf32>
      %c0_24 = arith.constant 0 : index
      %c0_25 = arith.constant 0 : index
      %41 = vector.load %arg14[%c0_24, %c0_25] : memref<128x128xf32, #tpu.memory_space<vmem>>, vector<128x128xf32>
      %42 = vector.broadcast %40 : vector<128x1xf32> to vector<128x128xf32>
      %43 = arith.mulf %41, %42 : vector<128x128xf32>
      %c0_26 = arith.constant 0 : index
      %c0_27 = arith.constant 0 : index
      %c0_28 = arith.constant 0 : index
      %44 = vector.load %arg8[%c0_26, %c0_27, %c0_28] : memref<1x128x128xf32, #tpu.memory_space<vmem>>, vector<1x128x128xf32>
      %45 = vector.shape_cast %44 : vector<1x128x128xf32> to vector<128x128xf32>
      %46 = vector.shape_cast %43 : vector<128x128xf32> to vector<1x128x128xf32>
      tpu.vector_store %arg8[%c0_26, %c0_27, %c0_28], %46 {strides = array<i32>} : memref<1x128x128xf32, #tpu.memory_space<vmem>>, vector<1x128x128xf32>,
    } else {
    }
    return
  }
  func.func @transform_0(%arg0: i32, %arg1: i32, %arg2: i32) -> (i32, i32, i32) {
    %c0_i32 = arith.constant 0 : i32
    %c0_i32_0 = arith.constant 0 : i32
    return %arg0, %arg1, %c0_i32 : i32, i32, i32
  }
  func.func @transform_1(%arg0: i32, %arg1: i32, %arg2: i32) -> (i32, i32, i32) {
    %c0_i32 = arith.constant 0 : i32
    %c0_i32_0 = arith.constant 0 : i32
    return %arg0, %arg2, %c0_i32 : i32, i32, i32
  }
  func.func @transform_2(%arg0: i32, %arg1: i32, %arg2: i32) -> (i32, i32) {
    %c0_i32 = arith.constant 0 : i32
    %c0_i32_0 = arith.constant 0 : i32
    %c0_i32_1 = arith.constant 0 : i32
    return %c0_i32, %c0_i32_0 : i32, i32
  }
  func.func @transform_3(%arg0: i32, %arg1: i32, %arg2: i32) -> (i32, i32) {
    %c0_i32 = arith.constant 0 : i32
    %c0_i32_0 = arith.constant 0 : i32
    %c0_i32_1 = arith.constant 0 : i32
    return %c0_i32, %c0_i32_0 : i32, i32
  }
  func.func @transform_4(%arg0: i32, %arg1: i32, %arg2: i32) -> (i32, i32) {
    %c0_i32 = arith.constant 0 : i32
    %c0_i32_0 = arith.constant 0 : i32
    %c0_i32_1 = arith.constant 0 : i32
    return %c0_i32, %c0_i32_0 : i32, i32
  }
  func.func @transform_5(%arg0: i32, %arg1: i32, %arg2: i32) -> (i32, i32, i32) {
    %c0_i32 = arith.constant 0 : i32
    %c0_i32_0 = arith.constant 0 : i32
    return %arg0, %arg1, %c0_i32 : i32, i32, i32
  }
}

</mosaic_0001>

<bundles_post_ra>
// kernel: tpu_custom_call.1
= control target key start
LH: loop header
LB: loop body
LE: loop exit
PB: predicated region body
PF: predicated region fallthrough
CT: control target
= control target key end

     0   :  { %s4351_s0 = inlined_call_operand.hbm [shape: f32[2,256,128], index: 0, kind: input, shape index: {}]   ;;  %s4352_s1 = inlined_call_operand.hbm [shape: f32[2,256,128], index: 1, kind: input, shape index: {}]   ;;  %s4353_s2 = inlined_call_operand.hbm [shape: f32[128,128], index: 2, kind: input, shape index: {}]   ;;  %s4354_s3 = inlined_call_operand.hbm [shape: f32[128,128], index: 3, kind: input, shape index: {}]   ;;  %s4355_s4 = inlined_call_operand.hbm [shape: f32[128,128], index: 4, kind: input, shape index: {}]   ;;  %s4356_s5 = inlined_call_operand.hbm [shape: f32[2,256,128], index: 5, kind: output, shape index: {}]  }
   0x1   :  { %4380 = sst [smem:[#allocation34_spill]] %s4353_s2 }
   0x2   :  { %4381 = sst [smem:[#allocation35_spill]] %s4354_s3 }
   0x3   :  { %4382 = sst [smem:[#allocation36_spill]] %s4355_s4 }
   0x4   :  { %4383 = sst [smem:[#allocation37_spill]] %s4356_s5 }
   0x5   :  { %10 = vsyncpa [#allocation9], 0 }
   0x6   :  { %12 = vsyncpa [#allocation9 + $0x1], 0 }
   0x7   :  { %13 = vsyncpa [#allocation12], 0 }
   0x8   :  { %15 = vsyncpa [#allocation12 + $0x1], 0 }
   0x9   :  { %16 = vsyncpa [#allocation15], 0 }
   0xa   :  { %17 = vsyncpa [#allocation10], 0 }
   0xb   :  { %19 = vsyncpa [#allocation10 + $0x1], 0  ;;  %s3424_s18 = smov 0   ;;  %s3426_s19 = smov 0  }
   0xc   :  { %s3428_s20 = smov 0   ;;  %s3430_s21 = smov 0  }
   0xd   :  { %s3432_s22 = smov 0   ;;  %s3434_s23 = smov 0  }
   0xe   :  { %s3436_s24 = smov 0   ;;  %s3438_s25 = smov 0  }
   0xf   :  { %s3440_s26 = smov 0   ;;  %s3442_s27 = smov 0  }
  0x10   :  { %s3444_s28 = smov 0   ;;  %s3446_s29 = smov 0  }
  0x11   :  { %s3448_s30 = smov 0  }
  0x12 LB: > { %4384 = sst [smem:[#allocation23_spill]] %s3342_s21  ;;  %s3488_s6 = sadd.s32 4294967295, %s3378_s30   ;;  %s3378_s30 = sphi %s3448_s30, %s25_s30   ;;  %s3374_s29 = sphi %s3446_s29, %s4450_s29   ;;  %s3370_s28 = sphi %s3444_s28, %s4438_s28   ;;  %s3366_s27 = sphi %s3442_s27, %s4449_s27   ;;  %s3362_s26 = sphi %s3440_s26, %s4448_s26   ;;  %s3358_s25 = sphi %s3438_s25, %s4447_s25   ;;  %s3354_s24 = sphi %s3436_s24, %s4446_s24   ;;  %s3350_s23 = sphi %s3434_s23, %s4445_s23   ;;  %s3346_s22 = sphi %s3432_s22, %s4444_s22   ;;  %s3342_s21 = sphi %s3430_s21, %s4443_s21   ;;  %s3338_s20 = sphi %s3428_s20, %s4442_s20   ;;  %s3334_s19 = sphi %s3426_s19, %s4441_s19   ;;  %s3330_s18 = sphi %s3424_s18, %s4440_s18  }
  0x13   : > { %4385 = sst [smem:[#allocation24_spill]] %s3354_s24  ;;  %s2174_s7 = sadd.s32 4294967294, %s3378_s30  }
  0x14   : > { %4386 = sst [smem:[#allocation25_spill]] %s3358_s25  ;;  %p66_p0 = scmp.ne.s32.totalorder %s3346_s22, %s3342_s21 }
  0x15   : > { %4387 = sst [smem:[#allocation26_spill]] %s3362_s26  ;;  %p4360_p1 = scmp.eq.s32.totalorder %s3488_s6, 0 }
  0x16   : > { %4388 = sst [smem:[#allocation27_spill]] %s3370_s28  ;;  %p94_p2 = scmp.ne.s32.totalorder %s3334_s19, %s3330_s18 }
  0x17   : > { %p3498_p4 = por %p4360_p1, %p66_p0  ;;  %p189_p5 = scmp.eq.s32.totalorder %s2174_s7, 7 }
  0x18   : > { %p3504_p6 = por %p94_p2, %p4360_p1  ;;  %p2175_p7 = scmp.ge.s32.totalorder %s3378_s30, 1 }
  0x19   : > { %s4389_s8 = scalar_select %p3498_p4, 1, 0 }
  0x1a   : > { %s4391_s9 = scalar_select %p3504_p6, 1, 0 }
  0x1b   : > { %4390 = sst [smem:[#allocation28_spill]] %s4389_s8  ;;  %p3509_p8 = por %p189_p5, %p66_p0 }
  0x1c   : > { %4392 = sst [smem:[#allocation29_spill]] %s4391_s9  ;;  %p196_p9 = scmp.lt.s32.totalorder %s3378_s30, 9 }
  0x1d   : > { %s4393_s10 = scalar_select %p3509_p8, 1, 0 }
  0x1e   : > { %p3514_p10 = pnand %p2175_p7, %p196_p9  ;;  %s3380_s12 = smov [#allocation13]  }
  0x1f   : > { %4394 = sst [smem:[#allocation30_spill]] %s4393_s10  ;;  %s208_s13 = sshll.u32 %s3380_s12, 4  ;;  %s3518_s13 = int_to_ptr.vmem [resolvable:$true] %s208_s13 }
  0x20   : > { %s4395_s11 = scalar_select %p3514_p10, 1, 0 }
  0x21   : > { %p2840_p11 = pneg %p3514_p10  ;;  %s3381_s15 = smov [#allocation14]  }
  0x22   : > { %s221_s16 = sshll.u32 %s3381_s15, 4  ;;  %s3382_s17 = smov [#allocation16]   ;;  %s3528_s16 = int_to_ptr.vmem [resolvable:$true] %s221_s16 }
  0x23   : > { %p3524_p12 = pnand %p2840_p11, %p4360_p1  ;;  %s3530_s18 = sshll.u32 %s3382_s17, 4  ;;  %s235_s18 = int_to_ptr.vmem [resolvable:$true] %s3530_s18 }
  0x24   : > { %s4397_s2 = sld [smem:[#allocation34_spill]] }
  0x25   : > { %p3540_p0 = pneg %p3524_p12 }
  0x2a   : > { %s3084_s12 = scalar_lea.hbm %s4397_s2, 2048 }
  0x2b   : > { %p3085_p13 = scmp.ne.s32.totalorder %s4397_s2, %s3084_s12  ;;  %p3091_p7 = scmp.lt.u32.totalorder %s3084_s12, %s4397_s2 }
  0x2d   : > { %p3087_p2 = pnand %p3540_p0, %p3085_p13 }
  0x2f   : > { %p3088_p5 = pneg %p3087_p2 }
  0x31   : > { %p3093_p9 = pnand %p3091_p7, %p3088_p5 }
  0x33   : > { %3096 = shalt.err (!%p3093_p9)
}
  0x34   : > { %s3097_s5 = scalar_lea.vmem %s3518_s13, 2048  ;;  %p3105_p8 = scmp.lt.s32.totalorder %s3518_s13, %s3518_s13 }
  0x35   : > { %p3098_p11 = scmp.ne.s32.totalorder %s3518_s13, %s3097_s5  ;;  %p3106_p6 = scmp.lt.s32.totalorder %s3097_s5, %s3097_s5 }
  0x37   : > { %p3100_p1 = pnand %p3098_p11, %p3540_p0  ;;  %p3107_p13 = por %p3106_p6, %p3105_p8 }
  0x39   : > { %p3101_p3 = pneg %p3100_p1 }
  0x3b   : > { %p3108_p2 = pnand %p3107_p13, %p3101_p3 }
  0x3d   : > { %3111 = shalt.err (!%p3108_p2)
}
  0x3e   : > { %s4369_s21 = smov 128   ;;  %s4371_s10 = smov 8  }
  0x3f   : > { %2843 = dma.hbm_to_vmem [thread:$0]  (!%p3524_p12), %s4397_s2, 2048, %s3518_s13, [#allocation12], %s4369_s21, %s4369_s21, %s4371_s10  }
  0x40   : > { %s4399_s3 = sld [smem:[#allocation35_spill]] }
  0x46   : > { %s3112_s5 = scalar_lea.hbm %s4399_s3, 2048 }
  0x47   : > { %p3113_p1 = scmp.ne.s32.totalorder %s4399_s3, %s3112_s5  ;;  %p3119_p8 = scmp.lt.u32.totalorder %s3112_s5, %s4399_s3 }
  0x49   : > { %p3115_p3 = pnand %p3113_p1, %p3540_p0 }
  0x4b   : > { %p3116_p6 = pneg %p3115_p3 }
  0x4d   : > { %p3121_p5 = pnand %p3119_p8, %p3116_p6 }
  0x4f   : > { %3124 = shalt.err (!%p3121_p5)
}
  0x50   : > { %s3125_s13 = scalar_lea.vmem %s3528_s16, 2048  ;;  %p3133_p13 = scmp.lt.s32.totalorder %s3528_s16, %s3528_s16 }
  0x51   : > { %p3126_p7 = scmp.ne.s32.totalorder %s3528_s16, %s3125_s13  ;;  %p3134_p2 = scmp.lt.s32.totalorder %s3125_s13, %s3125_s13 }
  0x53   : > { %p3128_p9 = pnand %p3126_p7, %p3540_p0  ;;  %p3135_p1 = por %p3134_p2, %p3133_p13 }
  0x55   : > { %p3129_p11 = pneg %p3128_p9 }
  0x57   : > { %p3136_p3 = pnand %p3135_p1, %p3129_p11 }
  0x59   : > { %3139 = shalt.err (!%p3136_p3)
}
  0x5a   : > { %2846 = dma.hbm_to_vmem [thread:$0]  (!%p3524_p12), %s4399_s3, 2048, %s3528_s16, [#allocation15], %s4369_s21, %s4369_s21, %s4371_s10  }
  0x5b   : > { %s4400_s4 = sld [smem:[#allocation36_spill]] }
  0x61   : > { %s3140_s7 = scalar_lea.hbm %s4400_s4, 2048 }
  0x62   : > { %p3141_p6 = scmp.ne.s32.totalorder %s4400_s4, %s3140_s7  ;;  %p3147_p7 = scmp.lt.u32.totalorder %s3140_s7, %s4400_s4 }
  0x64   : > { %p3143_p8 = pnand %p3141_p6, %p3540_p0 }
  0x66   : > { %p3144_p5 = pneg %p3143_p8 }
  0x68   : > { %p3149_p9 = pnand %p3147_p7, %p3144_p5 }
  0x6a   : > { %3152 = shalt.err (!%p3149_p9)
}
  0x6b   : > { %s3153_s13 = scalar_lea.vmem %s235_s18, 2048  ;;  %p3161_p1 = scmp.lt.s32.totalorder %s235_s18, %s235_s18 }
  0x6c   : > { %p3154_p11 = scmp.ne.s32.totalorder %s235_s18, %s3153_s13  ;;  %p3162_p3 = scmp.lt.s32.totalorder %s3153_s13, %s3153_s13 }
  0x6e   : > { %p3156_p13 = pnand %p3154_p11, %p3540_p0  ;;  %p3163_p4 = por %p3162_p3, %p3161_p1 }
  0x70   : > { %p3157_p2 = pneg %p3156_p13 }
  0x72   : > { %p3164_p10 = pnand %p3163_p4, %p3157_p2 }
  0x74   : > { %3167 = shalt.err (!%p3164_p10)
}
  0x75   : > { %2849 = dma.hbm_to_vmem [thread:$0]  (!%p3524_p12), %s4400_s4, 2048, %s235_s18, [#allocation15], %s4369_s21, %s4369_s21, %s4371_s10  }
  0x76   : > { %s37_s26 = sadd.s32 1, %s3366_s27  ;;  %s40_s14 = sadd.s32 1, %s3370_s28 }
  0x77   : > { %p38_p4 = scmp.ge.s32.totalorder %s37_s26, 2  ;;  %s44_s25 = sadd.s32 1, %s3374_s29 }
  0x78   : > { %s53_s8 = sadd.s32 1, %s3350_s23  ;;  %p60_p10 = scmp.ne.s32.totalorder %s3350_s23, %s3346_s22 }
  0x79   : > { %s4452_s26 = smov (%p38_p4, %s37_s26), 0  ;;  %s4454_s14 = smov (!%p38_p4, %s40_s14), %s3370_s28 }
  0x7a   : > { %4401 = sst [smem:[#allocation31_spill]] %s4452_s26  ;;  %p4379_p0 = scmp.eq.s32.totalorder %s3378_s30, 0 }
  0x7b   : > { %p42_p6 = scmp.ge.s32.totalorder %s4454_s14, 2  ;;  %s77_s9 = ssub.s32 %s3366_s27, %s4452_s26 }
  0x7c   : > { %p3626_p12 = por %p4379_p0, %p60_p10  ;;  %p4403_p8 = scmp.eq.s32.totalorder %s3488_s6, 7 }
  0x7d   : > { %s4456_s14 = smov (%p42_p6, %s4454_s14), 0  ;;  %s4458_s25 = smov (!%p42_p6, %s44_s25), %s3374_s29 }
  0x7e   : > { %p3632_p5 = por %p4403_p8, %p60_p10  ;;  %4406 = sst [smem:[#allocation33_spill]] %s4456_s14 }
  0x7f   : > { %s49_s12 = ssub.s32 %s3370_s28, %s4456_s14  ;;  %p4378_p7 = scmp.lt.s32.totalorder %s3378_s30, 8 }
  0x80   : > { %s4404_s7 = scalar_select %p3632_p5, 1, 0 }
  0x81   : > { %p46_p9 = scmp.ge.s32.totalorder %s4458_s25, 2  ;;  %s248_s15 = sand.u32 1, %s3350_s23  }
  0x82   : > { %4405 = sst [smem:[#allocation32_spill]] %s4404_s7  ;;  %s2180_s17 = sshll.u32 %s248_s15, 7 }
  0x83   : > { %s4460_s25 = smov (%p46_p9, %s4458_s25), 0  ;;  %s2181_s5 = sshll.u32 %s3370_s28, 4 }
  0x84   : > { %s48_s13 = ssub.s32 %s3374_s29, %s4460_s25  ;;  %s2182_s16 = sshll.u32 %s3374_s29, 5 }
  0x85   : > { %s50_s24 = sor.u32 %s49_s12, %s48_s13  ;;  %s3649_s21 = sor.u32 %s77_s9, %s48_s13 }
  0x86   : > { %p51_p11 = scmp.eq.s32.totalorder %s50_s24, 0  ;;  %s258_s10 = sadd.s32 %s2182_s16, %s2181_s5 }
  0x87   : > { %s252_s2 = scalar_lea.vmem [#allocation8], %s2180_s17  ;;  %s2183_s14 = sshll.u32 %s258_s10, 7 }
  0x88   : > { %s261_s3 = sshll.u32 %s252_s2, 4  ;;  %s3660_s28 = scalar_lea.hbm %s4351_s0, %s2183_s14  ;;  %s3655_s3 = int_to_ptr.vmem [resolvable:$true] %s261_s3 }
  0x89   : > { %s3653_s4 = scalar_select %p51_p11, %s3350_s23, %s53_s8  }
  0x8a   : > { %p3666_p2 = pnand %p4378_p7, %p3626_p12  ;;  %s2185_s2 = sshll.u32 %s3366_s27, 4 }
  0x8b   : > { %s3671_s10 = sadd.s32 %s2185_s2, %s2182_s16  ;;  %s3673_s8 = scalar_lea.sflag [#allocation9], %s248_s15 }
  0x8c   : > { %s3168_s26 = scalar_lea.hbm %s3660_s28, 2048  ;;  %p3170_p3 = pneg %p3666_p2 }
  0x8d   : > { %p3169_p1 = scmp.ne.s32.totalorder %s3660_s28, %s3168_s26  ;;  %s3173_s7 = scalar_lea.hbm %s4351_s0, 8192 }
  0x8e   : > { %p3174_p6 = scmp.lt.u32.totalorder %s3660_s28, %s4351_s0  ;;  %p3175_p12 = scmp.lt.u32.totalorder %s3173_s7, %s3168_s26 }
  0x8f   : > { %p3171_p4 = pnand %p3170_p3, %p3169_p1  ;;  %p3177_p9 = scmp.lt.u32.totalorder %s3168_s26, %s3660_s28 }
  0x90   : > { %p3176_p8 = por %p3175_p12, %p3174_p6 }
  0x91   : > { %p3172_p10 = pneg %p3171_p4 }
  0x92   : > { %p3178_p11 = por %p3177_p9, %p3176_p8 }
  0x94   : > { %p3179_p7 = pnand %p3178_p11, %p3172_p10 }
  0x96   : > { %3182 = shalt.err (!%p3179_p7)
}
  0x97   : > { %s3183_s15 = scalar_lea.vmem %s3655_s3, 2048  ;;  %s3385_s5 = smov [#allocation8]  }
  0x98   : > { %p3184_p1 = scmp.ne.s32.totalorder %s3655_s3, %s3183_s15  ;;  %s3188_s13 = sshll.u32 %s3385_s5, 4  ;;  %s3189_s13 = int_to_ptr.vmem [resolvable:$false] %s3188_s13 }
  0x99   : > { %s3190_s16 = scalar_lea.vmem %s3189_s13, 4096  ;;  %p3191_p13 = scmp.lt.s32.totalorder %s3655_s3, %s3189_s13 }
  0x9a   : > { %p3186_p4 = pnand %p3184_p1, %p3170_p3  ;;  %p3192_p6 = scmp.lt.s32.totalorder %s3190_s16, %s3183_s15 }
  0x9c   : > { %p3187_p0 = pneg %p3186_p4  ;;  %p3193_p12 = por %p3192_p6, %p3191_p13 }
  0x9e   : > { %p3194_p8 = pnand %p3193_p12, %p3187_p0 }
  0xa0   : > { %3197 = shalt.err (!%p3194_p8)
}
  0xa1   : > { %s4408_s24 = smov 8   ;;  %s4409_s2 = smov 128  }
  0xa2   : > { %2853 = dma.hbm_to_vmem [thread:$0]  (!%p3666_p2), %s3660_s28, 2048, %s3655_s3, %s3673_s8, %s4409_s2, %s4409_s2, %s4408_s24  }
  0xa3   : > { %s2187_s26 = sshll.u32 %s3671_s10, 7  ;;  %s81_s14 = sadd.s32 1, %s3338_s20 }
  0xa4   : > { %p4410_p0 = scmp.eq.s32.totalorder %s3649_s21, 0  ;;  %p88_p7 = scmp.ne.s32.totalorder %s3338_s20, %s3334_s19 }
  0xa5   : > { %s271_s18 = sand.u32 1, %s3378_s30   ;;  %s3717_s17 = scalar_lea.hbm %s4352_s1, %s2187_s26 }
  0xa6   : > { %s3709_s9 = scalar_select %p4410_p0, %s3338_s20, %s81_s14  }
  0xa7   : > { %s273_s15 = sand.u32 1, %s3338_s20   ;;  %p4411_p13 = scmp.eq.s32.totalorder %s3378_s30, 0 }
  0xa8   : > { %s2184_s3 = sshll.u32 %s273_s15, 7  ;;  %p4412_p2 = scmp.lt.s32.totalorder %s3378_s30, 8 }
  0xa9   : > { %p90_p3 = por %p88_p7, %p4411_p13  ;;  %s275_s28 = scalar_lea.vmem [#allocation11], %s2184_s3 }
  0xaa   : > { %s284_s10 = sshll.u32 %s275_s28, 4  ;;  %s3730_s8 = scalar_lea.sflag [#allocation12], %s271_s18  ;;  %s3728_s10 = int_to_ptr.vmem [resolvable:$true] %s284_s10 }
  0xab   : > { %p3724_p10 = pnand %p4412_p2, %p90_p3  ;;  %s3198_s5 = scalar_lea.hbm %s3717_s17, 2048 }
  0xac   : > { %p3199_p9 = scmp.ne.s32.totalorder %s3717_s17, %s3198_s5  ;;  %s3203_s26 = scalar_lea.hbm %s4352_s1, 8192 }
  0xad   : > { %p3200_p11 = pneg %p3724_p10  ;;  %p3204_p6 = scmp.lt.u32.totalorder %s3717_s17, %s4352_s1 }
  0xae   : > { %p3205_p12 = scmp.lt.u32.totalorder %s3203_s26, %s3198_s5  ;;  %p3207_p0 = scmp.lt.u32.totalorder %s3198_s5, %s3717_s17 }
  0xaf   : > { %p3201_p1 = pnand %p3200_p11, %p3199_p9 }
  0xb0   : > { %p3206_p8 = por %p3205_p12, %p3204_p6 }
  0xb1   : > { %p3202_p4 = pneg %p3201_p1 }
  0xb2   : > { %p3208_p7 = por %p3207_p0, %p3206_p8 }
  0xb4   : > { %p3209_p13 = pnand %p3208_p7, %p3202_p4 }
  0xb6   : > { %3212 = shalt.err (!%p3209_p13)
}
  0xb7   : > { %s3213_s18 = scalar_lea.vmem %s3728_s10, 2048  ;;  %s3386_s12 = smov [#allocation11]  }
  0xb8   : > { %p3214_p3 = scmp.ne.s32.totalorder %s3728_s10, %s3213_s18  ;;  %s3218_s15 = sshll.u32 %s3386_s12, 4  ;;  %s3219_s15 = int_to_ptr.vmem [resolvable:$false] %s3218_s15 }
  0xb9   : > { %s3220_s3 = scalar_lea.vmem %s3219_s15, 4096  ;;  %p3221_p1 = scmp.lt.s32.totalorder %s3728_s10, %s3219_s15 }
  0xba   : > { %p3216_p2 = pnand %p3214_p3, %p3200_p11  ;;  %p3222_p6 = scmp.lt.s32.totalorder %s3220_s3, %s3213_s18 }
  0xbc   : > { %p3217_p9 = pneg %p3216_p2  ;;  %p3223_p12 = por %p3222_p6, %p3221_p1 }
  0xbe   : > { %p3224_p8 = pnand %p3223_p12, %p3217_p9 }
  0xc0   : > { %3227 = shalt.err (!%p3224_p8)
}
  0xc1   : > { %2856 = dma.hbm_to_vmem [thread:$0]  (!%p3724_p10), %s3717_s17, 2048, %s3728_s10, %s3730_s8, %s4409_s2, %s4409_s2, %s4408_s24  }
  0xc2   : > { %p4414_p11 = scmp.ne.s32.totalorder %s4395_s11, 0 }
  0xc3   : > { %s4415_s28 = sld [smem:[#allocation28_spill]] (!%p4414_p11)  ;;  %s3764_s5 = sand.u32 (!%p4414_p11), 1, %s3346_s22  }
  0xc4   : > { %296 = sbr.rel (%p4414_p11) target bundleno = 1767 (0x6e7), region = 40  ;;  %s2189_s13 = sshll.u32 (!%p4414_p11), %s3764_s5, 7 }
  0xc5   : > { %s299_s16 = scalar_lea.sflag (!%p4414_p11), [#allocation9], %s3764_s5  ;;  %s3768_s26 = scalar_lea.vmem (!%p4414_p11), [#allocation8], %s2189_s13 }
  0xc9   : > { %p4416_p4 = scmp.ne.s32.totalorder (!%p4414_p11), %s4415_s28, 0 }
  0xcb   : > { %3309 = dma.done.wait (%p4416_p4), %s299_s16, 2048  }
  0xcc   : > { %3311 = vsyncadd (%p4416_p4), %s299_s16, 4294965248  ;;  %s4417_s24 = sld [smem:[#allocation29_spill]]  ;;  %s307_s11 = sand.u32 1, %s3488_s6  }
  0xcd   : > { %s309_s2 = sand.u32 1, %s3334_s19   ;;  %s308_s10 = scalar_lea.sflag [#allocation12], %s307_s11 }
  0xce   : > { %s2190_s17 = sshll.u32 %s309_s2, 7 }
  0xcf   : > { %s3776_s21 = scalar_lea.vmem [#allocation11], %s2190_s17 }
  0xd2   : > { %p4418_p10 = scmp.ne.s32.totalorder %s4417_s24, 0 }
  0xd4   : > { %3313 = dma.done.wait (%p4418_p10), %s308_s10, 2048  }
  0xd5   : > { %3315 = vsyncadd (%p4418_p10), %s308_s10, 4294965248  ;;  %p4419_p0 = scmp.eq.s32.totalorder %s3488_s6, 0 }
  0xd7   : > { %3317 = dma.done.wait (%p4419_p0), [#allocation12], 2048   ;;  %p4420_p7 = pmov %p4419_p0 }
  0xd8   : > { %p4421_p13 = pmov %p4419_p0 }
  0xd9   : > { %3319 = vsyncadd (%p4420_p7), [#allocation12], 4294965248 }
  0xda   : > { %3321 = dma.done.wait (%p4421_p13), [#allocation15], 4096   ;;  %p4422_p3 = pmov %p4419_p0 }
  0xdb   : > { %s3790_s8 = scalar_lea.vmem [#allocation17], %s2189_s13  ;;  %s4423_s14 = sld [smem:[#allocation25_spill]] }
  0xdc   : > { %3323 = vsyncadd (%p4422_p3), [#allocation15], 4294963200 }
  0xe1   : > { %p2195_p2 = scmp.ne.s32.totalorder %s4423_s14, 0 }
  0xe2   : > { %v378_v0 = vld [vmem:[#allocation14] sm:$0xff] (!%p2195_p2)  ;;  %v379_v1 = vld [vmem:[#allocation14 + $0x8] sm:$0xff] (!%p2195_p2)  ;;  %v380_v5 = vld [vmem:[#allocation14 + $0x10] sm:$0xff] (!%p2195_p2)  ;;  %s4424_s6 = sld [smem:[#allocation24_spill]] (!%p2195_p2) }
  0xe3   : > { %361 = sbr.rel (%p2195_p2) target bundleno = 504 (0x1f8), region = 64  ;;  %v539_v2 = vld [vmem:[#allocation16] sm:$0xff] (!%p2195_p2)  ;;  %v2646_v3 = vpack.c.bf16 (!%p2195_p2), %v379_v1, %v378_v0  ;;  %v540_v4 = vld [vmem:[#allocation16 + $0x8] sm:$0xff] (!%p2195_p2)  ;;  %v381_v6 = vld [vmem:[#allocation14 + $0x18] sm:$0xff] (!%p2195_p2) }
  0xe4   : > { %v2678_v7 = vpack.c.bf16 (!%p2195_p2), %v540_v4, %v539_v2  ;;  %v2650_v8 = vpack.c.bf16 (!%p2195_p2), %v381_v6, %v380_v5  ;;  %v541_v9 = vld [vmem:[#allocation16 + $0x10] sm:$0xff] (!%p2195_p2)  ;;  %v542_v10 = vld [vmem:[#allocation16 + $0x18] sm:$0xff] (!%p2195_p2)  ;;  %v382_v11 = vld [vmem:[#allocation14 + $0x20] sm:$0xff] (!%p2195_p2) }
  0xe5   : > { %2647 = vmatprep.subr.bf16.mxu0 (!%p2195_p2), %v2646_v3  ;;  %v2682_v12 = vpack.c.bf16 (!%p2195_p2), %v542_v10, %v541_v9  ;;  %v383_v13 = vld [vmem:[#allocation14 + $0x28] sm:$0xff] (!%p2195_p2)  ;;  %v543_v14 = vld [vmem:[#allocation16 + $0x20] sm:$0xff] (!%p2195_p2)  ;;  %v384_v18 = vld [vmem:[#allocation14 + $0x30] sm:$0xff] (!%p2195_p2) }
  0xe6   : > { %v544_v15 = vld [vmem:[#allocation16 + $0x28] sm:$0xff] (!%p2195_p2)  ;;  %2679 = vmatprep.subr.bf16.mxu1 (!%p2195_p2), %v2678_v7  ;;  %2649 = vmatpush3.bf16.msra.mxu0 (!%p2195_p2), %v2646_v3  ;;  %v2654_v16 = vpack.c.bf16 (!%p2195_p2), %v383_v13, %v382_v11  ;;  %v385_v19 = vld [vmem:[#allocation14 + $0x38] sm:$0xff] (!%p2195_p2)  ;;  %v545_v20 = vld [vmem:[#allocation16 + $0x30] sm:$0xff] (!%p2195_p2) }
  0xe7   : > { %2681 = vmatpush3.bf16.msra.mxu1 (!%p2195_p2), %v2678_v7  ;;  %2651 = vmatprep.subr.bf16.mxu0 (!%p2195_p2), %v2650_v8  ;;  %v2686_v17 = vpack.c.bf16 (!%p2195_p2), %v544_v15, %v543_v14  ;;  %v546_v21 = vld [vmem:[#allocation16 + $0x38] sm:$0xff] (!%p2195_p2)  ;;  %v2658_v22 = vpack.c.bf16 (!%p2195_p2), %v385_v19, %v384_v18  ;;  %v386_v24 = vld [vmem:[#allocation14 + $0x40] sm:$0xff] (!%p2195_p2)  ;;  %v387_v25 = vld [vmem:[#allocation14 + $0x48] sm:$0xff] (!%p2195_p2) }
  0xe8   : > { %2683 = vmatprep.subr.bf16.mxu1 (!%p2195_p2), %v2682_v12  ;;  %v2690_v23 = vpack.c.bf16 (!%p2195_p2), %v546_v21, %v545_v20  ;;  %v362_v26 = vld [vmem:[%s3776_s21] sm:$0xff] (!%p2195_p2)  ;;  %v548_v28 = vld [vmem:[#allocation16 + $0x48] sm:$0xff] (!%p2195_p2)  ;;  %v2662_v29 = vpack.c.bf16 (!%p2195_p2), %v387_v25, %v386_v24  ;;  %v388_v31 = vld [vmem:[#allocation14 + $0x50] sm:$0xff] (!%p2195_p2)  ;;  %s2196_s7 = sshll.u32 (!%p2195_p2), %s4424_s6, 7 }
  0xe9   : > { %v547_v27 = vld [vmem:[#allocation16 + $0x40] sm:$0xff] (!%p2195_p2)  ;;  %2398 = vmatprep.mubr.f32.mxu0 (!%p2195_p2), %v362_v26  ;;  %2454 = vmatprep.mubr.f32.mxu1 (!%p2195_p2), %v362_v26  ;;  %v389_v32 = vld [vmem:[#allocation14 + $0x58] sm:$0xff] (!%p2195_p2)  ;;  %v549_v33 = vld [vmem:[#allocation16 + $0x50] sm:$0xff] (!%p2195_p2)  ;;  %s3810_s18 = scalar_lea.vmem (!%p2195_p2), [#allocation3], %s2196_s7  ;;  %s3813_s12 = scalar_lea.vmem (!%p2195_p2), [#allocation4], %s2196_s7 }
  0xea   : > { %2653 = vmatpush3.bf16.msra.mxu0 %v2650_v8  ;;  %v2694_v30 = vpack.c.bf16 %v548_v28, %v547_v27  ;;  %v550_v34 = vld [vmem:[#allocation16 + $0x58] sm:$0xff]  ;;  %v2666_v35 = vpack.c.bf16 %v389_v32, %v388_v31  ;;  %v390_v37 = vld [vmem:[#allocation14 + $0x60] sm:$0xff]  ;;  %v391_v38 = vld [vmem:[#allocation14 + $0x68] sm:$0xff] }
  0xeb   : > { %2685 = vmatpush3.bf16.msra.mxu1 %v2682_v12  ;;  %2655 = vmatprep.subr.bf16.mxu0 %v2654_v16  ;;  %v2698_v36 = vpack.c.bf16 %v550_v34, %v549_v33  ;;  %v551_v39 = vld [vmem:[#allocation16 + $0x60] sm:$0xff]  ;;  %v552_v40 = vld [vmem:[#allocation16 + $0x68] sm:$0xff]  ;;  %v2670_v41 = vpack.c.bf16 %v391_v38, %v390_v37  ;;  %v392_v43 = vld [vmem:[#allocation14 + $0x70] sm:$0xff] }
  0xec   : > { %2687 = vmatprep.subr.bf16.mxu1 %v2686_v17  ;;  %v2702_v42 = vpack.c.bf16 %v552_v40, %v551_v39  ;;  %v393_v44 = vld [vmem:[#allocation14 + $0x78] sm:$0xff]  ;;  %v553_v45 = vld [vmem:[#allocation16 + $0x70] sm:$0xff]  ;;  %v363_v49 = vld [vmem:[%s3776_s21 + $0x8] sm:$0xff] }
  0xed   : > { %v554_v46 = vld [vmem:[#allocation16 + $0x78] sm:$0xff]  ;;  %v2674_v47 = vpack.c.bf16 %v393_v44, %v392_v43  ;;  %v364_v50 = vld [vmem:[%s3776_s21 + $0x10] sm:$0xff]  ;;  %v366_v52 = vld [vmem:[%s3776_s21 + $0x20] sm:$0xff] }
  0xee   : > { %2657 = vmatpush3.bf16.msra.mxu0 %v2654_v16  ;;  %v2706_v48 = vpack.c.bf16 %v554_v46, %v553_v45  ;;  %v365_v51 = vld [vmem:[%s3776_s21 + $0x18] sm:$0xff]  ;;  %v367_v53 = vld [vmem:[%s3776_s21 + $0x28] sm:$0xff]  ;;  %v368_v54 = vld [vmem:[%s3776_s21 + $0x30] sm:$0xff] }
  0xef   : > { %2689 = vmatpush3.bf16.msra.mxu1 %v2686_v17  ;;  %2659 = vmatprep.subr.bf16.mxu0 %v2658_v22  ;;  %v369_v55 = vld [vmem:[%s3776_s21 + $0x38] sm:$0xff]  ;;  %v370_v56 = vld [vmem:[%s3776_s21 + $0x40] sm:$0xff]  ;;  %v371_v57 = vld [vmem:[%s3776_s21 + $0x48] sm:$0xff] }
  0xf0   : > { %2691 = vmatprep.subr.bf16.mxu1 %v2690_v23  ;;  %v372_v58 = vld [vmem:[%s3776_s21 + $0x50] sm:$0xff]  ;;  %v373_v59 = vld [vmem:[%s3776_s21 + $0x58] sm:$0xff]  ;;  %v374_v60 = vld [vmem:[%s3776_s21 + $0x60] sm:$0xff] }
  0xf1   : > { %v375_v61 = vld [vmem:[%s3776_s21 + $0x68] sm:$0xff]  ;;  %v376_v62 = vld [vmem:[%s3776_s21 + $0x70] sm:$0xff]  ;;  %v377_v63 = vld [vmem:[%s3776_s21 + $0x78] sm:$0xff] }
  0xf2   : > { %2661 = vmatpush3.bf16.msra.mxu0 %v2658_v22 }
  0xf3   : > { %2693 = vmatpush3.bf16.msra.mxu1 %v2690_v23  ;;  %2663 = vmatprep.subr.bf16.mxu0 %v2662_v29 }
  0xf4   : > { %2695 = vmatprep.subr.bf16.mxu1 %v2694_v30 }
  0xf6   : > { %2665 = vmatpush3.bf16.msra.mxu0 %v2662_v29 }
  0xf7   : > { %2697 = vmatpush3.bf16.msra.mxu1 %v2694_v30  ;;  %2667 = vmatprep.subr.bf16.mxu0 %v2666_v35 }
  0xf8   : > { %2699 = vmatprep.subr.bf16.mxu1 %v2698_v36 }
  0xfa   : > { %2669 = vmatpush3.bf16.msra.mxu0 %v2666_v35 }
  0xfb   : > { %2701 = vmatpush3.bf16.msra.mxu1 %v2698_v36  ;;  %2671 = vmatprep.subr.bf16.mxu0 %v2670_v41 }
  0xfc   : > { %2703 = vmatprep.subr.bf16.mxu1 %v2702_v42 }
  0xfe   : > { %2673 = vmatpush3.bf16.msra.mxu0 %v2670_v41 }
  0xff   : > { %2705 = vmatpush3.bf16.msra.mxu1 %v2702_v42  ;;  %2675 = vmatprep.subr.bf16.mxu0 %v2674_v47 }
 0x100   : > { %2707 = vmatprep.subr.bf16.mxu1 %v2706_v48 }
 0x102   : > { %2677 = vmatpush3.bf16.msra.mxu0 %v2674_v47 }
 0x103   : > { %2709 = vmatpush3.bf16.msra.mxu1 %v2706_v48 }
 0x105   : > { %2399 = vmatmul.mubr.f32.vlgmr.msra.gmra.mrb[0].mxu0 %v363_v49 }
 0x106   : > { %2455 = vmatmul.mubr.f32.vlgmr.msra.gmra.mrb[0].mxu1 %v363_v49  ;;  %2401 = vmatprep.mubr.f32.mxu0 %v364_v50 }
 0x107   : > { %2457 = vmatprep.mubr.f32.mxu1 %v364_v50 }
 0x109   : > { %2402 = vmatmul.mubr.f32.gmra.mrb[2].mxu0 %v365_v51 }
 0x10a   : > { %2458 = vmatmul.mubr.f32.gmra.mrb[2].mxu1 %v365_v51  ;;  %2404 = vmatprep.mubr.f32.mxu0 %v366_v52 }
 0x10b   : > { %2460 = vmatprep.mubr.f32.mxu1 %v366_v52 }
 0x10d   : > { %2405 = vmatmul.mubr.f32.gmra.mrb[4].mxu0 %v367_v53 }
 0x10e   : > { %2461 = vmatmul.mubr.f32.gmra.mrb[4].mxu1 %v367_v53  ;;  %2407 = vmatprep.mubr.f32.mxu0 %v368_v54 }
 0x10f   : > { %2463 = vmatprep.mubr.f32.mxu1 %v368_v54 }
 0x111   : > { %2408 = vmatmul.mubr.f32.gmra.mrb[6].mxu0 %v369_v55 }
 0x112   : > { %2464 = vmatmul.mubr.f32.gmra.mrb[6].mxu1 %v369_v55  ;;  %2410 = vmatprep.mubr.f32.mxu0 %v370_v56 }
 0x113   : > { %2466 = vmatprep.mubr.f32.mxu1 %v370_v56 }
 0x115   : > { %2411 = vmatmul.mubr.f32.gmra.mrb[8].mxu0 %v371_v57 }
 0x116   : > { %2467 = vmatmul.mubr.f32.gmra.mrb[8].mxu1 %v371_v57  ;;  %2413 = vmatprep.mubr.f32.mxu0 %v372_v58 }
 0x117   : > { %2469 = vmatprep.mubr.f32.mxu1 %v372_v58 }
 0x119   : > { %2414 = vmatmul.mubr.f32.gmra.mrb[10].mxu0 %v373_v59 }
 0x11a   : > { %2470 = vmatmul.mubr.f32.gmra.mrb[10].mxu1 %v373_v59  ;;  %2416 = vmatprep.mubr.f32.mxu0 %v374_v60 }
 0x11b   : > { %2472 = vmatprep.mubr.f32.mxu1 %v374_v60 }
 0x11d   : > { %2417 = vmatmul.mubr.f32.gmra.mrb[12].mxu0 %v375_v61 }
 0x11e   : > { %2473 = vmatmul.mubr.f32.gmra.mrb[12].mxu1 %v375_v61  ;;  %2419 = vmatprep.mubr.f32.mxu0 %v376_v62 }
 0x11f   : > { %2475 = vmatprep.mubr.f32.mxu1 %v376_v62 }
 0x121   : > { %2420 = vmatmul.mubr.f32.gmra.mrb[14].mxu0 %v377_v63 }
 0x122   : > { %2476 = vmatmul.mubr.f32.gmra.mrb[14].mxu1 %v377_v63 }
 0x1d8   : > { %v2400_v0 = vpop.f32.mrb[0].mxu0 }
 0x1d9   : > { %703 = vst [vmem:[%s3810_s18 + $0x8] sm:$0xff] %v2400_v0  ;;  %v2456_v1 = vpop.f32.mrb[0].mxu1  ;;  %v460_v2 = vpop.f32.mrb[1].mxu0 }
 0x1da   : > { %720 = vst [vmem:[%s3813_s12 + $0x8] sm:$0xff] %v2456_v1  ;;  %702 = vst [vmem:[%s3810_s18] sm:$0xff] %v460_v2  ;;  %v621_v3 = vpop.f32.mrb[1].mxu1 }
 0x1db   : > { %719 = vst [vmem:[%s3813_s12] sm:$0xff] %v621_v3 }
 0x1dc   : > { %v2403_v4 = vpop.f32.mrb[2].mxu0 }
 0x1dd   : > { %705 = vst [vmem:[%s3810_s18 + $0x18] sm:$0xff] %v2403_v4  ;;  %v2459_v5 = vpop.f32.mrb[2].mxu1  ;;  %v470_v6 = vpop.f32.mrb[3].mxu0 }
 0x1de   : > { %722 = vst [vmem:[%s3813_s12 + $0x18] sm:$0xff] %v2459_v5  ;;  %704 = vst [vmem:[%s3810_s18 + $0x10] sm:$0xff] %v470_v6  ;;  %v631_v7 = vpop.f32.mrb[3].mxu1 }
 0x1df   : > { %721 = vst [vmem:[%s3813_s12 + $0x10] sm:$0xff] %v631_v7 }
 0x1e0   : > { %v2406_v8 = vpop.f32.mrb[4].mxu0 }
 0x1e1   : > { %707 = vst [vmem:[%s3810_s18 + $0x28] sm:$0xff] %v2406_v8  ;;  %v2462_v9 = vpop.f32.mrb[4].mxu1  ;;  %v480_v10 = vpop.f32.mrb[5].mxu0 }
 0x1e2   : > { %724 = vst [vmem:[%s3813_s12 + $0x28] sm:$0xff] %v2462_v9  ;;  %706 = vst [vmem:[%s3810_s18 + $0x20] sm:$0xff] %v480_v10  ;;  %v641_v11 = vpop.f32.mrb[5].mxu1 }
 0x1e3   : > { %723 = vst [vmem:[%s3813_s12 + $0x20] sm:$0xff] %v641_v11 }
 0x1e4   : > { %v2409_v12 = vpop.f32.mrb[6].mxu0 }
 0x1e5   : > { %709 = vst [vmem:[%s3810_s18 + $0x38] sm:$0xff] %v2409_v12  ;;  %v2465_v13 = vpop.f32.mrb[6].mxu1  ;;  %v490_v14 = vpop.f32.mrb[7].mxu0 }
 0x1e6   : > { %726 = vst [vmem:[%s3813_s12 + $0x38] sm:$0xff] %v2465_v13  ;;  %708 = vst [vmem:[%s3810_s18 + $0x30] sm:$0xff] %v490_v14  ;;  %v651_v15 = vpop.f32.mrb[7].mxu1 }
 0x1e7   : > { %725 = vst [vmem:[%s3813_s12 + $0x30] sm:$0xff] %v651_v15 }
 0x1e8   : > { %v2412_v16 = vpop.f32.mrb[8].mxu0 }
 0x1e9   : > { %711 = vst [vmem:[%s3810_s18 + $0x48] sm:$0xff] %v2412_v16  ;;  %v2468_v17 = vpop.f32.mrb[8].mxu1  ;;  %v500_v18 = vpop.f32.mrb[9].mxu0 }
 0x1ea   : > { %728 = vst [vmem:[%s3813_s12 + $0x48] sm:$0xff] %v2468_v17  ;;  %710 = vst [vmem:[%s3810_s18 + $0x40] sm:$0xff] %v500_v18  ;;  %v661_v19 = vpop.f32.mrb[9].mxu1 }
 0x1eb   : > { %727 = vst [vmem:[%s3813_s12 + $0x40] sm:$0xff] %v661_v19 }
 0x1ec   : > { %v2415_v20 = vpop.f32.mrb[10].mxu0 }
 0x1ed   : > { %713 = vst [vmem:[%s3810_s18 + $0x58] sm:$0xff] %v2415_v20  ;;  %v2471_v21 = vpop.f32.mrb[10].mxu1  ;;  %v510_v22 = vpop.f32.mrb[11].mxu0 }
 0x1ee   : > { %730 = vst [vmem:[%s3813_s12 + $0x58] sm:$0xff] %v2471_v21  ;;  %712 = vst [vmem:[%s3810_s18 + $0x50] sm:$0xff] %v510_v22  ;;  %v671_v23 = vpop.f32.mrb[11].mxu1 }
 0x1ef   : > { %729 = vst [vmem:[%s3813_s12 + $0x50] sm:$0xff] %v671_v23 }
 0x1f0   : > { %v2418_v24 = vpop.f32.mrb[12].mxu0 }
 0x1f1   : > { %715 = vst [vmem:[%s3810_s18 + $0x68] sm:$0xff] %v2418_v24  ;;  %v2474_v25 = vpop.f32.mrb[12].mxu1  ;;  %v520_v26 = vpop.f32.mrb[13].mxu0 }
 0x1f2   : > { %732 = vst [vmem:[%s3813_s12 + $0x68] sm:$0xff] %v2474_v25  ;;  %714 = vst [vmem:[%s3810_s18 + $0x60] sm:$0xff] %v520_v26  ;;  %v681_v27 = vpop.f32.mrb[13].mxu1 }
 0x1f3   : > { %731 = vst [vmem:[%s3813_s12 + $0x60] sm:$0xff] %v681_v27 }
 0x1f4   : > { %v2421_v28 = vpop.f32.mrb[14].mxu0 }
 0x1f5   : > { %717 = vst [vmem:[%s3810_s18 + $0x78] sm:$0xff] %v2421_v28  ;;  %v2477_v29 = vpop.f32.mrb[14].mxu1  ;;  %v530_v30 = vpop.f32.mrb[15].mxu0 }
 0x1f6   : > { %734 = vst [vmem:[%s3813_s12 + $0x78] sm:$0xff] %v2477_v29  ;;  %716 = vst [vmem:[%s3810_s18 + $0x70] sm:$0xff] %v530_v30  ;;  %v691_v31 = vpop.f32.mrb[15].mxu1 }
 0x1f7   : > { %733 = vst [vmem:[%s3813_s12 + $0x70] sm:$0xff] %v691_v31 }
 0x1f8 PF: > { %s4425_s15 = sld [smem:[#allocation24_spill]] }
 0x1fe   : > { %p2197_p9 = scmp.ne.s32.totalorder %s4425_s15, 0 }
 0x1ff   : > { %v755_v32 = vld [vmem:[#allocation13] sm:$0xff] (!%p2197_p9)  ;;  %v756_v33 = vld [vmem:[#allocation13 + $0x8] sm:$0xff] (!%p2197_p9)  ;;  %v757_v34 = vld [vmem:[#allocation13 + $0x10] sm:$0xff] (!%p2197_p9)  ;;  %vm948_vm0 = vcmask (!%p2197_p9), 7168   ;;  %v3387_v8 = vmov (!%p2197_p9), -inf   ;;  %v3388_v9 = vmov (!%p2197_p9), 0.0  }
 0x200   : > { %738 = sbr.rel (%p2197_p9) target bundleno = 774 (0x306), region = 68  ;;  %v2710_v35 = vpack.c.bf16 (!%p2197_p9), %v756_v33, %v755_v32  ;;  %v758_v36 = vld [vmem:[#allocation13 + $0x18] sm:$0xff] (!%p2197_p9)  ;;  %v759_v38 = vld [vmem:[#allocation13 + $0x20] sm:$0xff] (!%p2197_p9)  ;;  %v760_v39 = vld [vmem:[#allocation13 + $0x28] sm:$0xff] (!%p2197_p9)  ;;  %949 = vst.msk [vmem:[#allocation5] sm:$0xff] (!%p2197_p9), %vm948_vm0, %v3387_v8 }
 0x201   : > { %v2714_v37 = vpack.c.bf16 (!%p2197_p9), %v758_v36, %v757_v34  ;;  %v2718_v40 = vpack.c.bf16 (!%p2197_p9), %v760_v39, %v759_v38  ;;  %v739_v41 = vld [vmem:[%s3768_s26] sm:$0xff] (!%p2197_p9)  ;;  %v761_v43 = vld [vmem:[#allocation13 + $0x30] sm:$0xff] (!%p2197_p9)  ;;  %v762_v44 = vld [vmem:[#allocation13 + $0x38] sm:$0xff] (!%p2197_p9)  ;;  %950 = vst.msk [vmem:[#allocation5 + $0x8] sm:$0xff] (!%p2197_p9), %vm948_vm0, %v3387_v8 }
 0x202   : > { %2711 = vmatprep.subr.bf16.mxu0 (!%p2197_p9), %v2710_v35  ;;  %2806 = vmatprep.subr.bf16.mxu1 (!%p2197_p9), %v2710_v35  ;;  %v747_v42 = vld [vmem:[%s3768_s26 + $0x40] sm:$0xff] (!%p2197_p9)  ;;  %v2722_v45 = vpack.c.bf16 (!%p2197_p9), %v762_v44, %v761_v43  ;;  %v764_v47 = vld [vmem:[#allocation13 + $0x48] sm:$0xff] (!%p2197_p9)  ;;  %v765_v49 = vld [vmem:[#allocation13 + $0x50] sm:$0xff] (!%p2197_p9)  ;;  %951 = vst.msk [vmem:[#allocation5 + $0x10] sm:$0xff] (!%p2197_p9), %vm948_vm0, %v3387_v8 }
 0x203   : > { %2713 = vmatpush3.bf16.msra.mxu0 (!%p2197_p9), %v2710_v35  ;;  %2814 = vmatpush3.bf16.msra.mxu1 (!%p2197_p9), %v2710_v35  ;;  %v763_v46 = vld [vmem:[#allocation13 + $0x40] sm:$0xff] (!%p2197_p9)  ;;  %v766_v50 = vld [vmem:[#allocation13 + $0x58] sm:$0xff] (!%p2197_p9)  ;;  %v768_v53 = vld [vmem:[#allocation13 + $0x68] sm:$0xff] (!%p2197_p9)  ;;  %952 = vst.msk [vmem:[#allocation5 + $0x18] sm:$0xff] (!%p2197_p9), %vm948_vm0, %v3387_v8 }
 0x204   : > { %2715 = vmatprep.subr.bf16.mxu0 (!%p2197_p9), %v2714_v37  ;;  %2807 = vmatprep.subr.bf16.mxu1 (!%p2197_p9), %v2714_v37  ;;  %v2726_v48 = vpack.c.bf16 (!%p2197_p9), %v764_v47, %v763_v46  ;;  %v2730_v51 = vpack.c.bf16 (!%p2197_p9), %v766_v50, %v765_v49  ;;  %v767_v52 = vld [vmem:[#allocation13 + $0x60] sm:$0xff] (!%p2197_p9)  ;;  %v769_v55 = vld [vmem:[#allocation13 + $0x70] sm:$0xff] (!%p2197_p9)  ;;  %v770_v56 = vld [vmem:[#allocation13 + $0x78] sm:$0xff] (!%p2197_p9)  ;;  %953 = vst.msk [vmem:[#allocation5 + $0x20] sm:$0xff] (!%p2197_p9), %vm948_vm0, %v3387_v8 }
 0x205   : > { %2510 = vmatprep.mubr.f32.mxu0 (!%p2197_p9), %v739_v41  ;;  %2522 = vmatprep.mubr.f32.mxu1 (!%p2197_p9), %v747_v42  ;;  %v2734_v54 = vpack.c.bf16 (!%p2197_p9), %v768_v53, %v767_v52  ;;  %v2738_v57 = vpack.c.bf16 (!%p2197_p9), %v770_v56, %v769_v55  ;;  %v740_v58 = vld [vmem:[%s3768_s26 + $0x8] sm:$0xff] (!%p2197_p9)  ;;  %v741_v60 = vld [vmem:[%s3768_s26 + $0x10] sm:$0xff] (!%p2197_p9)  ;;  %v742_v62 = vld [vmem:[%s3768_s26 + $0x18] sm:$0xff] (!%p2197_p9)  ;;  %954 = vst.msk [vmem:[#allocation5 + $0x28] sm:$0xff] (!%p2197_p9), %vm948_vm0, %v3387_v8 }
 0x206   : > { %v748_v59 = vld [vmem:[%s3768_s26 + $0x48] sm:$0xff] (!%p2197_p9)  ;;  %v749_v61 = vld [vmem:[%s3768_s26 + $0x50] sm:$0xff] (!%p2197_p9)  ;;  %v750_v63 = vld [vmem:[%s3768_s26 + $0x58] sm:$0xff] (!%p2197_p9)  ;;  %955 = vst.msk [vmem:[#allocation5 + $0x30] sm:$0xff] (!%p2197_p9), %vm948_vm0, %v3387_v8 }
 0x207   : > { %2717 = vmatpush3.bf16.msra.mxu0 %v2714_v37  ;;  %2815 = vmatpush3.bf16.msra.mxu1 %v2714_v37  ;;  %v743_v0 = vld [vmem:[%s3768_s26 + $0x20] sm:$0xff]  ;;  %v744_v2 = vld [vmem:[%s3768_s26 + $0x28] sm:$0xff]  ;;  %v745_v4 = vld [vmem:[%s3768_s26 + $0x30] sm:$0xff]  ;;  %956 = vst.msk [vmem:[#allocation5 + $0x38] sm:$0xff] %vm948_vm0, %v3387_v8 }
 0x208   : > { %2719 = vmatprep.subr.bf16.mxu0 %v2718_v40  ;;  %2808 = vmatprep.subr.bf16.mxu1 %v2718_v40  ;;  %v751_v1 = vld [vmem:[%s3768_s26 + $0x60] sm:$0xff]  ;;  %v752_v3 = vld [vmem:[%s3768_s26 + $0x68] sm:$0xff]  ;;  %v753_v5 = vld [vmem:[%s3768_s26 + $0x70] sm:$0xff]  ;;  %957 = vst.msk [vmem:[#allocation5 + $0x40] sm:$0xff] %vm948_vm0, %v3387_v8 }
 0x209   : > { %v746_v6 = vld [vmem:[%s3768_s26 + $0x38] sm:$0xff]  ;;  %958 = vst.msk [vmem:[#allocation5 + $0x48] sm:$0xff] %vm948_vm0, %v3387_v8  ;;  %959 = vst.msk [vmem:[#allocation5 + $0x50] sm:$0xff] %vm948_vm0, %v3387_v8 }
 0x20a   : > { %v754_v7 = vld [vmem:[%s3768_s26 + $0x78] sm:$0xff]  ;;  %960 = vst.msk [vmem:[#allocation5 + $0x58] sm:$0xff] %vm948_vm0, %v3387_v8  ;;  %961 = vst.msk [vmem:[#allocation5 + $0x60] sm:$0xff] %vm948_vm0, %v3387_v8 }
 0x20b   : > { %2721 = vmatpush3.bf16.msra.mxu0 %v2718_v40  ;;  %2816 = vmatpush3.bf16.msra.mxu1 %v2718_v40  ;;  %962 = vst.msk [vmem:[#allocation5 + $0x68] sm:$0xff] %vm948_vm0, %v3387_v8  ;;  %963 = vst.msk [vmem:[#allocation5 + $0x70] sm:$0xff] %vm948_vm0, %v3387_v8 }
 0x20c   : > { %2723 = vmatprep.subr.bf16.mxu0 %v2722_v45  ;;  %2809 = vmatprep.subr.bf16.mxu1 %v2722_v45  ;;  %964 = vst.msk [vmem:[#allocation5 + $0x78] sm:$0xff] %vm948_vm0, %v3387_v8  ;;  %965 = vst.msk [vmem:[#allocation6] sm:$0xff] %vm948_vm0, %v3388_v9 }
 0x20d   : > { %966 = vst.msk [vmem:[#allocation6 + $0x8] sm:$0xff] %vm948_vm0, %v3388_v9  ;;  %967 = vst.msk [vmem:[#allocation6 + $0x10] sm:$0xff] %vm948_vm0, %v3388_v9 }
 0x20e   : > { %968 = vst.msk [vmem:[#allocation6 + $0x18] sm:$0xff] %vm948_vm0, %v3388_v9  ;;  %969 = vst.msk [vmem:[#allocation6 + $0x20] sm:$0xff] %vm948_vm0, %v3388_v9 }
 0x20f   : > { %2725 = vmatpush3.bf16.msra.mxu0 %v2722_v45  ;;  %2817 = vmatpush3.bf16.msra.mxu1 %v2722_v45  ;;  %970 = vst.msk [vmem:[#allocation6 + $0x28] sm:$0xff] %vm948_vm0, %v3388_v9  ;;  %971 = vst.msk [vmem:[#allocation6 + $0x30] sm:$0xff] %vm948_vm0, %v3388_v9 }
 0x210   : > { %2727 = vmatprep.subr.bf16.mxu0 %v2726_v48  ;;  %2810 = vmatprep.subr.bf16.mxu1 %v2726_v48  ;;  %972 = vst.msk [vmem:[#allocation6 + $0x38] sm:$0xff] %vm948_vm0, %v3388_v9  ;;  %973 = vst.msk [vmem:[#allocation6 + $0x40] sm:$0xff] %vm948_vm0, %v3388_v9 }
 0x211   : > { %974 = vst.msk [vmem:[#allocation6 + $0x48] sm:$0xff] %vm948_vm0, %v3388_v9  ;;  %975 = vst.msk [vmem:[#allocation6 + $0x50] sm:$0xff] %vm948_vm0, %v3388_v9 }
 0x212   : > { %976 = vst.msk [vmem:[#allocation6 + $0x58] sm:$0xff] %vm948_vm0, %v3388_v9  ;;  %977 = vst.msk [vmem:[#allocation6 + $0x60] sm:$0xff] %vm948_vm0, %v3388_v9 }
 0x213   : > { %2729 = vmatpush3.bf16.msra.mxu0 %v2726_v48  ;;  %2818 = vmatpush3.bf16.msra.mxu1 %v2726_v48  ;;  %978 = vst.msk [vmem:[#allocation6 + $0x68] sm:$0xff] %vm948_vm0, %v3388_v9  ;;  %979 = vst.msk [vmem:[#allocation6 + $0x70] sm:$0xff] %vm948_vm0, %v3388_v9 }
 0x214   : > { %2731 = vmatprep.subr.bf16.mxu0 %v2730_v51  ;;  %2811 = vmatprep.subr.bf16.mxu1 %v2730_v51  ;;  %980 = vst.msk [vmem:[#allocation6 + $0x78] sm:$0xff] %vm948_vm0, %v3388_v9  ;;  %981 = vst [vmem:[#allocation7] sm:$0xff] %v3388_v9 }
 0x215   : > { %982 = vst [vmem:[#allocation7 + $0x8] sm:$0xff] %v3388_v9  ;;  %983 = vst [vmem:[#allocation7 + $0x10] sm:$0xff] %v3388_v9 }
 0x216   : > { %984 = vst [vmem:[#allocation7 + $0x18] sm:$0xff] %v3388_v9  ;;  %985 = vst [vmem:[#allocation7 + $0x20] sm:$0xff] %v3388_v9 }
 0x217   : > { %2733 = vmatpush3.bf16.msra.mxu0 %v2730_v51  ;;  %2819 = vmatpush3.bf16.msra.mxu1 %v2730_v51  ;;  %986 = vst [vmem:[#allocation7 + $0x28] sm:$0xff] %v3388_v9  ;;  %987 = vst [vmem:[#allocation7 + $0x30] sm:$0xff] %v3388_v9 }
 0x218   : > { %2735 = vmatprep.subr.bf16.mxu0 %v2734_v54  ;;  %2812 = vmatprep.subr.bf16.mxu1 %v2734_v54  ;;  %988 = vst [vmem:[#allocation7 + $0x38] sm:$0xff] %v3388_v9  ;;  %989 = vst [vmem:[#allocation7 + $0x40] sm:$0xff] %v3388_v9 }
 0x219   : > { %990 = vst [vmem:[#allocation7 + $0x48] sm:$0xff] %v3388_v9  ;;  %991 = vst [vmem:[#allocation7 + $0x50] sm:$0xff] %v3388_v9 }
 0x21a   : > { %992 = vst [vmem:[#allocation7 + $0x58] sm:$0xff] %v3388_v9  ;;  %993 = vst [vmem:[#allocation7 + $0x60] sm:$0xff] %v3388_v9 }
 0x21b   : > { %2737 = vmatpush3.bf16.msra.mxu0 %v2734_v54  ;;  %2820 = vmatpush3.bf16.msra.mxu1 %v2734_v54  ;;  %994 = vst [vmem:[#allocation7 + $0x68] sm:$0xff] %v3388_v9  ;;  %995 = vst [vmem:[#allocation7 + $0x70] sm:$0xff] %v3388_v9 }
 0x21c   : > { %2739 = vmatprep.subr.bf16.mxu0 %v2738_v57  ;;  %2813 = vmatprep.subr.bf16.mxu1 %v2738_v57  ;;  %996 = vst [vmem:[#allocation7 + $0x78] sm:$0xff] %v3388_v9 }
 0x21f   : > { %2741 = vmatpush3.bf16.msra.mxu0 %v2738_v57  ;;  %2821 = vmatpush3.bf16.msra.mxu1 %v2738_v57 }
 0x222   : > { %2511 = vmatmul.mubr.f32.vlgmr.msra.gmra.mrb[0].mxu0 %v740_v58  ;;  %2523 = vmatmul.mubr.f32.vlgmr.msra.gmra.mrb[0].mxu1 %v748_v59 }
 0x223   : > { %2513 = vmatprep.mubr.f32.mxu0 %v741_v60  ;;  %2525 = vmatprep.mubr.f32.mxu1 %v749_v61 }
 0x226   : > { %2514 = vmatmul.mubr.f32.gmra.mrb[2].mxu0 %v742_v62  ;;  %2526 = vmatmul.mubr.f32.gmra.mrb[2].mxu1 %v750_v63 }
 0x227   : > { %2516 = vmatprep.mubr.f32.mxu0 %v743_v0  ;;  %2528 = vmatprep.mubr.f32.mxu1 %v751_v1 }
 0x22a   : > { %2517 = vmatmul.mubr.f32.gmra.mrb[4].mxu0 %v744_v2  ;;  %2529 = vmatmul.mubr.f32.gmra.mrb[4].mxu1 %v752_v3 }
 0x22b   : > { %2519 = vmatprep.mubr.f32.mxu0 %v745_v4  ;;  %2531 = vmatprep.mubr.f32.mxu1 %v753_v5 }
 0x22e   : > { %2520 = vmatmul.mubr.f32.gmra.mrb[6].mxu0 %v746_v6  ;;  %2532 = vmatmul.mubr.f32.gmra.mrb[6].mxu1 %v754_v7 }
 0x2f5   : > { %v2512_v10 = vpop.f32.mrb[0].mxu0  ;;  %v2524_v11 = vpop.f32.mrb[0].mxu1 }
 0x2f6   : > { %v917_v12 = vmul.f32 0.088388346, %v2512_v10  ;;  %v925_v13 = vmul.f32 0.088388346, %v2524_v11  ;;  %v837_v14 = vpop.f32.mrb[1].mxu0  ;;  %v877_v15 = vpop.f32.mrb[1].mxu1 }
 0x2f7   : > { %v916_v16 = vmul.f32 0.088388346, %v837_v14  ;;  %v924_v17 = vmul.f32 0.088388346, %v877_v15 }
 0x2f8   : > { %933 = vst [vmem:[#allocation2 + $0x8] sm:$0xff] %v917_v12  ;;  %941 = vst [vmem:[#allocation2 + $0x48] sm:$0xff] %v925_v13 }
 0x2f9   : > { %932 = vst [vmem:[#allocation2] sm:$0xff] %v916_v16  ;;  %940 = vst [vmem:[#allocation2 + $0x40] sm:$0xff] %v924_v17  ;;  %v2515_v18 = vpop.f32.mrb[2].mxu0  ;;  %v2527_v19 = vpop.f32.mrb[2].mxu1 }
 0x2fa   : > { %v919_v20 = vmul.f32 0.088388346, %v2515_v18  ;;  %v927_v21 = vmul.f32 0.088388346, %v2527_v19  ;;  %v847_v22 = vpop.f32.mrb[3].mxu0  ;;  %v887_v23 = vpop.f32.mrb[3].mxu1 }
 0x2fb   : > { %v918_v24 = vmul.f32 0.088388346, %v847_v22  ;;  %v926_v25 = vmul.f32 0.088388346, %v887_v23 }
 0x2fc   : > { %935 = vst [vmem:[#allocation2 + $0x18] sm:$0xff] %v919_v20  ;;  %943 = vst [vmem:[#allocation2 + $0x58] sm:$0xff] %v927_v21 }
 0x2fd   : > { %934 = vst [vmem:[#allocation2 + $0x10] sm:$0xff] %v918_v24  ;;  %942 = vst [vmem:[#allocation2 + $0x50] sm:$0xff] %v926_v25  ;;  %v2518_v26 = vpop.f32.mrb[4].mxu0  ;;  %v2530_v27 = vpop.f32.mrb[4].mxu1 }
 0x2fe   : > { %v921_v28 = vmul.f32 0.088388346, %v2518_v26  ;;  %v929_v29 = vmul.f32 0.088388346, %v2530_v27  ;;  %v857_v30 = vpop.f32.mrb[5].mxu0  ;;  %v897_v31 = vpop.f32.mrb[5].mxu1 }
 0x2ff   : > { %v920_v32 = vmul.f32 0.088388346, %v857_v30  ;;  %v928_v33 = vmul.f32 0.088388346, %v897_v31 }
 0x300   : > { %937 = vst [vmem:[#allocation2 + $0x28] sm:$0xff] %v921_v28  ;;  %945 = vst [vmem:[#allocation2 + $0x68] sm:$0xff] %v929_v29 }
 0x301   : > { %936 = vst [vmem:[#allocation2 + $0x20] sm:$0xff] %v920_v32  ;;  %944 = vst [vmem:[#allocation2 + $0x60] sm:$0xff] %v928_v33  ;;  %v2521_v34 = vpop.f32.mrb[6].mxu0  ;;  %v2533_v35 = vpop.f32.mrb[6].mxu1 }
 0x302   : > { %v923_v36 = vmul.f32 0.088388346, %v2521_v34  ;;  %v931_v37 = vmul.f32 0.088388346, %v2533_v35  ;;  %v867_v38 = vpop.f32.mrb[7].mxu0  ;;  %v907_v39 = vpop.f32.mrb[7].mxu1 }
 0x303   : > { %v922_v40 = vmul.f32 0.088388346, %v867_v38  ;;  %v930_v41 = vmul.f32 0.088388346, %v907_v39 }
 0x304   : > { %939 = vst [vmem:[#allocation2 + $0x38] sm:$0xff] %v923_v36  ;;  %947 = vst [vmem:[#allocation2 + $0x78] sm:$0xff] %v931_v37 }
 0x305   : > { %938 = vst [vmem:[#allocation2 + $0x30] sm:$0xff] %v922_v40  ;;  %946 = vst [vmem:[#allocation2 + $0x70] sm:$0xff] %v930_v41 }
 0x306 PF: > { %s4426_s3 = sld [smem:[#allocation24_spill]]  ;;  %v1032_v42 = vld [vmem:[#allocation2] sm:$0xff]  ;;  %v1033_v3 = vld [vmem:[#allocation2 + $0x8] sm:$0xff]  ;;  %v1034_v4 = vld [vmem:[#allocation2 + $0x10] sm:$0xff]  ;;  %v3389_v28 = vmov 0   ;;  %vm1513_vm1 = vcmask 7168  }
 0x307   : > { %2566 = vmatprep.mubr.f32.mxu0 %v1032_v42  ;;  %v1035_v5 = vld [vmem:[#allocation2 + $0x18] sm:$0xff]  ;;  %v1037_v7 = vld [vmem:[#allocation2 + $0x28] sm:$0xff]  ;;  %v1040_v10 = vld [vmem:[#allocation2 + $0x40] sm:$0xff]  ;;  %2984 = vset.pattern.permute.xlu0 %v3389_v28 }
 0x308   : > { %v1036_v6 = vld [vmem:[#allocation2 + $0x20] sm:$0xff]  ;;  %v1041_v11 = vld [vmem:[#allocation2 + $0x48] sm:$0xff]  ;;  %v1042_v12 = vld [vmem:[#allocation2 + $0x50] sm:$0xff]  ;;  %2985 = vset.pattern.permute.xlu1 %v3389_v28 }
 0x309   : > { %v1043_v13 = vld [vmem:[#allocation2 + $0x58] sm:$0xff]  ;;  %v1044_v14 = vld [vmem:[#allocation2 + $0x60] sm:$0xff]  ;;  %v1045_v15 = vld [vmem:[#allocation2 + $0x68] sm:$0xff] }
 0x30b   : > { %v1039_v9 = vld [vmem:[#allocation2 + $0x38] sm:$0xff] }
 0x30c   : > { %s2198_s28 = sshll.u32 %s4426_s3, 7  ;;  %v1038_v8 = vld [vmem:[#allocation2 + $0x30] sm:$0xff]  ;;  %v1047_v17 = vld [vmem:[#allocation2 + $0x78] sm:$0xff]  ;;  %p2199_p1 = scmp.ne.s32.totalorder %s4426_s3, 1 }
 0x30d   : > { %s3898_s13 = scalar_lea.vmem [#allocation3], %s2198_s28  ;;  %v1046_v16 = vld [vmem:[#allocation2 + $0x70] sm:$0xff]  ;;  %s3966_s16 = scalar_lea.vmem [#allocation4], %s2198_s28 }
 0x30e   : > { %v999_v43 = vld [vmem:[%s3898_s13] sm:$0xff]  ;;  %v1000_v44 = vld [vmem:[%s3898_s13 + $0x8] sm:$0xff]  ;;  %v1001_v45 = vld [vmem:[%s3898_s13 + $0x10] sm:$0xff] }
 0x30f   : > { %v2742_v46 = vpack.c.bf16 %v1000_v44, %v999_v43  ;;  %v1002_v47 = vld [vmem:[%s3898_s13 + $0x18] sm:$0xff]  ;;  %v1003_v49 = vld [vmem:[%s3898_s13 + $0x20] sm:$0xff]  ;;  %v1004_v50 = vld [vmem:[%s3898_s13 + $0x28] sm:$0xff] }
 0x310   : > { %v2746_v48 = vpack.c.bf16 %v1002_v47, %v1001_v45  ;;  %v2750_v51 = vpack.c.bf16 %v1004_v50, %v1003_v49  ;;  %v1005_v52 = vld [vmem:[%s3898_s13 + $0x30] sm:$0xff]  ;;  %v1006_v53 = vld [vmem:[%s3898_s13 + $0x38] sm:$0xff]  ;;  %v1007_v55 = vld [vmem:[%s3898_s13 + $0x40] sm:$0xff] }
 0x311   : > { %2743 = vmatprep.subr.bf16.mxu0 %v2742_v46  ;;  %v2754_v54 = vpack.c.bf16 %v1006_v53, %v1005_v52  ;;  %v1008_v56 = vld [vmem:[%s3898_s13 + $0x48] sm:$0xff]  ;;  %v1009_v58 = vld [vmem:[%s3898_s13 + $0x50] sm:$0xff]  ;;  %v1010_v59 = vld [vmem:[%s3898_s13 + $0x58] sm:$0xff] }
 0x312   : > { %2745 = vmatpush3.bf16.xpose.msra.mxu0 %v2742_v46  ;;  %v2758_v57 = vpack.c.bf16 %v1008_v56, %v1007_v55  ;;  %v2762_v60 = vpack.c.bf16 %v1010_v59, %v1009_v58  ;;  %v1011_v61 = vld [vmem:[%s3898_s13 + $0x60] sm:$0xff]  ;;  %v1012_v62 = vld [vmem:[%s3898_s13 + $0x68] sm:$0xff]  ;;  %v1013_v0 = vld [vmem:[%s3898_s13 + $0x70] sm:$0xff] }
 0x313   : > { %2747 = vmatprep.subr.bf16.mxu0 %v2746_v48  ;;  %v2766_v63 = vpack.c.bf16 %v1012_v62, %v1011_v61  ;;  %v1014_v1 = vld [vmem:[%s3898_s13 + $0x78] sm:$0xff]  ;;  %v1016_v35 = vld [vmem:[%s3966_s16] sm:$0xff]  ;;  %v1017_v36 = vld [vmem:[%s3966_s16 + $0x8] sm:$0xff] }
 0x314   : > { %v2770_v2 = vpack.c.bf16 %v1014_v1, %v1013_v0  ;;  %v1018_v37 = vld [vmem:[%s3966_s16 + $0x10] sm:$0xff]  ;;  %v2774_v38 = vpack.c.bf16 %v1017_v36, %v1016_v35  ;;  %v1019_v39 = vld [vmem:[%s3966_s16 + $0x18] sm:$0xff]  ;;  %v1020_v41 = vld [vmem:[%s3966_s16 + $0x20] sm:$0xff] }
 0x315   : > { %v2778_v40 = vpack.c.bf16 %v1019_v39, %v1018_v37  ;;  %v1021_v42 = vld [vmem:[%s3966_s16 + $0x28] sm:$0xff]  ;;  %v1022_v44 = vld [vmem:[%s3966_s16 + $0x30] sm:$0xff]  ;;  %v1023_v45 = vld [vmem:[%s3966_s16 + $0x38] sm:$0xff] }
 0x316   : > { %2775 = vmatprep.subr.bf16.mxu1 %v2774_v38  ;;  %v2782_v43 = vpack.c.bf16 %v1021_v42, %v1020_v41  ;;  %v2786_v46 = vpack.c.bf16 %v1023_v45, %v1022_v44  ;;  %v3976_v47 = vld [vmem:[#allocation5] sm:$0xff]  ;;  %v3981_v50 = vld [vmem:[#allocation5 + $0x18] sm:$0xff]  ;;  %v3996_v59 = vld [vmem:[#allocation5 + $0x10] sm:$0xff] }
 0x317   : > { %2777 = vmatpush3.bf16.msra.mxu1 %v2774_v38  ;;  %v1024_v53 = vld [vmem:[%s3966_s16 + $0x40] sm:$0xff]  ;;  %v1026_v62 = vld [vmem:[%s3966_s16 + $0x50] sm:$0xff]  ;;  %v1202_v37 = vld [vmem:[#allocation5 + $0x48] sm:$0xff] }
 0x318   : > { %2779 = vmatprep.subr.bf16.mxu1 %v2778_v40  ;;  %v4043_v39 = vld [vmem:[#allocation5 + $0x50] sm:$0xff]  ;;  %v1204_v44 = vld [vmem:[#allocation5 + $0x58] sm:$0xff] }
 0x31a   : > { %2749 = vmatpush3.bf16.xpose.msra.mxu0 %v2746_v48 }
 0x31b   : > { %2751 = vmatprep.subr.bf16.mxu0 %v2750_v51  ;;  %2781 = vmatpush3.bf16.msra.mxu1 %v2778_v40 }
 0x31c   : > { %2783 = vmatprep.subr.bf16.mxu1 %v2782_v43 }
 0x31f   : > { %2785 = vmatpush3.bf16.msra.mxu1 %v2782_v43 }
 0x320   : > { %2787 = vmatprep.subr.bf16.mxu1 %v2786_v46 }
 0x322   : > { %2753 = vmatpush3.bf16.xpose.msra.mxu0 %v2750_v51  ;;  %v3983_v51 = vld [vmem:[#allocation5 + $0x8] sm:$0xff] }
 0x323   : > { %2755 = vmatprep.subr.bf16.mxu0 %v2754_v54  ;;  %2789 = vmatpush3.bf16.msra.mxu1 %v2786_v46  ;;  %v4053_v46 = vld [vmem:[#allocation5 + $0x60] sm:$0xff] }
 0x32a   : > { %2757 = vmatpush3.bf16.xpose.msra.mxu0 %v2754_v54  ;;  %v1025_v54 = vld [vmem:[%s3966_s16 + $0x48] sm:$0xff] }
 0x32b   : > { %2759 = vmatprep.subr.bf16.mxu0 %v2758_v57 }
 0x332   : > { %2761 = vmatpush3.bf16.xpose.msra.mxu0 %v2758_v57  ;;  %v2790_v57 = vpack.c.bf16 %v1025_v54, %v1024_v53  ;;  %v1206_v54 = vld [vmem:[#allocation5 + $0x68] sm:$0xff] }
 0x333   : > { %2763 = vmatprep.subr.bf16.mxu0 %v2762_v60 }
 0x334   : > { %2791 = vmatprep.subr.bf16.mxu1 %v2790_v57 }
 0x335   : > { %2793 = vmatpush3.bf16.msra.mxu1 %v2790_v57  ;;  %v4064_v57 = vld [vmem:[#allocation5 + $0x70] sm:$0xff] }
 0x33a   : > { %2765 = vmatpush3.bf16.xpose.msra.mxu0 %v2762_v60  ;;  %v4000_v60 = vld [vmem:[#allocation5 + $0x20] sm:$0xff] }
 0x33b   : > { %2767 = vmatprep.subr.bf16.mxu0 %v2766_v63 }
 0x342   : > { %2769 = vmatpush3.bf16.xpose.msra.mxu0 %v2766_v63  ;;  %v1027_v63 = vld [vmem:[%s3966_s16 + $0x58] sm:$0xff] }
 0x343   : > { %2771 = vmatprep.subr.bf16.mxu0 %v2770_v2 }
 0x34a   : > { %2773 = vmatpush3.bf16.xpose.msra.mxu0 %v2770_v2  ;;  %v2794_v2 = vpack.c.bf16 %v1027_v63, %v1026_v62 }
 0x34c   : > { %2795 = vmatprep.subr.bf16.mxu1 %v2794_v2 }
 0x34d   : > { %2797 = vmatpush3.bf16.msra.mxu1 %v2794_v2 }
 0x351   : > { %2567 = vmatmul.mubr.f32.vlgmr.msra.gmra.mrb[0].mxu0 %v1033_v3  ;;  %v4010_v3 = vld [vmem:[#allocation5 + $0x28] sm:$0xff] }
 0x352   : > { %2569 = vmatprep.mubr.f32.mxu0 %v1034_v4 }
 0x355   : > { %2570 = vmatmul.mubr.f32.gmra.mrb[2].mxu0 %v1035_v5  ;;  %v4017_v5 = vld [vmem:[#allocation5 + $0x30] sm:$0xff] }
 0x356   : > { %2572 = vmatprep.mubr.f32.mxu0 %v1036_v6 }
 0x359   : > { %2573 = vmatmul.mubr.f32.gmra.mrb[4].mxu0 %v1037_v7  ;;  %v1028_v7 = vld [vmem:[%s3966_s16 + $0x60] sm:$0xff] }
 0x35a   : > { %2575 = vmatprep.mubr.f32.mxu0 %v1038_v8  ;;  %v1029_v8 = vld [vmem:[%s3966_s16 + $0x68] sm:$0xff] }
 0x35d   : > { %2576 = vmatmul.mubr.f32.gmra.mrb[6].mxu0 %v1039_v9 }
 0x35e   : > { %2578 = vmatprep.mubr.f32.mxu0 %v1040_v10 }
 0x361   : > { %2579 = vmatmul.mubr.f32.gmra.mrb[8].mxu0 %v1041_v11  ;;  %v2798_v11 = vpack.c.bf16 %v1029_v8, %v1028_v7 }
 0x362   : > { %2581 = vmatprep.mubr.f32.mxu0 %v1042_v12  ;;  %v4025_v12 = vld [vmem:[#allocation5 + $0x38] sm:$0xff] }
 0x363   : > { %2799 = vmatprep.subr.bf16.mxu1 %v2798_v11 }
 0x364   : > { %2801 = vmatpush3.bf16.msra.mxu1 %v2798_v11 }
 0x365   : > { %2582 = vmatmul.mubr.f32.gmra.mrb[10].mxu0 %v1043_v13 }
 0x366   : > { %2584 = vmatprep.mubr.f32.mxu0 %v1044_v14  ;;  %v4031_v14 = vld [vmem:[#allocation5 + $0x40] sm:$0xff] }
 0x369   : > { %2585 = vmatmul.mubr.f32.gmra.mrb[12].mxu0 %v1045_v15 }
 0x36a   : > { %2587 = vmatprep.mubr.f32.mxu0 %v1046_v16  ;;  %v1030_v16 = vld [vmem:[%s3966_s16 + $0x70] sm:$0xff] }
 0x36d   : > { %2588 = vmatmul.mubr.f32.gmra.mrb[14].mxu0 %v1047_v17  ;;  %v1031_v17 = vld [vmem:[%s3966_s16 + $0x78] sm:$0xff] }
 0x36e   : > { %v2802_v36 = vpack.c.bf16 %v1031_v17, %v1030_v16 }
 0x370   : > { %2803 = vmatprep.subr.bf16.mxu1 %v2802_v36 }
 0x371   : > { %2805 = vmatpush3.bf16.msra.mxu1 %v2802_v36 }
 0x424   : > { %v3916_v18 = vpop.f32.mrb[0].mxu0 }
 0x425   : > { %v3918_v19 = vpop.f32.mrb[1].mxu0 }
 0x426   : > { %1209 = vmax.xlane.f32.xlu0 %v3918_v19 }
 0x428   : > { %v3921_v20 = vpop.f32.mrb[2].mxu0 }
 0x429   : > { %1215 = vmax.xlane.f32.xlu1 %v3921_v20  ;;  %v3924_v21 = vpop.f32.mrb[3].mxu0 }
 0x42a   : > { %1211 = vmax.xlane.f32.xlu0 %v3916_v18 }
 0x42c   : > { %v3927_v22 = vpop.f32.mrb[4].mxu0 }
 0x42d   : > { %1213 = vmax.xlane.f32.xlu1 %v3924_v21  ;;  %v3930_v23 = vpop.f32.mrb[5].mxu0 }
 0x42e   : > { %1217 = vmax.xlane.f32.xlu0 %v3930_v23 }
 0x430   : > { %v3933_v24 = vpop.f32.mrb[6].mxu0 }
 0x431   : > { %1219 = vmax.xlane.f32.xlu1 %v3927_v22  ;;  %v3936_v25 = vpop.f32.mrb[7].mxu0 }
 0x432   : > { %1221 = vmax.xlane.f32.xlu0 %v3936_v25 }
 0x434   : > { %v3939_v26 = vpop.f32.mrb[8].mxu0 }
 0x435   : > { %1223 = vmax.xlane.f32.xlu1 %v3933_v24  ;;  %v3942_v27 = vpop.f32.mrb[9].mxu0 }
 0x436   : > { %1225 = vmax.xlane.f32.xlu0 %v3942_v27 }
 0x438   : > { %v3945_v29 = vpop.f32.mrb[10].mxu0 }
 0x439   : > { %1227 = vmax.xlane.f32.xlu1 %v3939_v26  ;;  %v3948_v30 = vpop.f32.mrb[11].mxu0 }
 0x43a   : > { %1229 = vmax.xlane.f32.xlu0 %v3948_v30 }
 0x43c   : > { %v3951_v31 = vpop.f32.mrb[12].mxu0 }
 0x43d   : > { %1231 = vmax.xlane.f32.xlu1 %v3945_v29  ;;  %v3954_v32 = vpop.f32.mrb[13].mxu0 }
 0x43e   : > { %1233 = vmax.xlane.f32.xlu0 %v3954_v32 }
 0x440   : > { %v3957_v33 = vpop.f32.mrb[14].mxu0 }
 0x441   : > { %1235 = vmax.xlane.f32.xlu1 %v3951_v31  ;;  %v3960_v34 = vpop.f32.mrb[15].mxu0 }
 0x442   : > { %1237 = vmax.xlane.f32.xlu0 %v3960_v34 }
 0x445   : > { %1239 = vmax.xlane.f32.xlu1 %v3957_v33 }
 0x4b3   : > { %v1210_v48 = vpop.xlane.xlu0 %1209 }
 0x4b4   : > { %v3979_v49 = vmax.f32 %v3976_v47, %v1210_v48 }
 0x4b6   : > { %1819 = vst.msk [vmem:[#allocation5] sm:$0xff] %vm1513_vm1, %v3979_v49  ;;  %v1216_v52 = vpop.xlane.xlu1 %1215  ;;  %1307 = vperm.xlu0 %2984, %v3979_v49   ;;  %v1257_v40 = vsub.f32 %v3976_v47, %v3979_v49 }
 0x4b7   : > { %v3991_v55 = vmax.f32 %v3981_v50, %v1216_v52  ;;  %v1212_v56 = vpop.xlane.xlu0 %1211 }
 0x4b8   : > { %v3994_v58 = vmax.f32 %v3983_v51, %v1212_v56  ;;  %v1273_v48 = vmul.f32 1.442695, %v1257_v40 }
 0x4b9   : > { %1822 = vst.msk [vmem:[#allocation5 + $0x18] sm:$0xff] %vm1513_vm1, %v3991_v55  ;;  %v1260_v47 = vsub.f32 %v3981_v50, %v3991_v55 }
 0x4ba   : > { %1820 = vst.msk [vmem:[#allocation5 + $0x8] sm:$0xff] %vm1513_vm1, %v3994_v58  ;;  %v1214_v61 = vpop.xlane.xlu1 %1213  ;;  %1312 = vperm.xlu1 %2985, %v3994_v58   ;;  %2986 = vpow2.f32 %v1273_v48 }
 0x4bb   : > { %v4008_v0 = vmax.f32 %v3996_v59, %v1214_v61  ;;  %v1218_v1 = vpop.xlane.xlu0 %1217  ;;  %v1279_v61 = vmul.f32 1.442695, %v1260_v47 }
 0x4bc   : > { %v4013_v4 = vmax.f32 %v4000_v60, %v1218_v1  ;;  %v4069_v1 = vld [vmem:[#allocation5 + $0x78] sm:$0xff] }
 0x4bd   : > { %1821 = vst.msk [vmem:[#allocation5 + $0x10] sm:$0xff] %vm1513_vm1, %v4008_v0  ;;  %2988 = vpow2.f32 %v1279_v61 }
 0x4be   : > { %v1220_v6 = vpop.xlane.xlu1 %1219  ;;  %1322 = vperm.xlu1 %2985, %v3991_v55   ;;  %1823 = vst.msk [vmem:[#allocation5 + $0x20] sm:$0xff] %vm1513_vm1, %v4013_v4  ;;  %v1261_v36 = vsub.f32 %v4000_v60, %v4013_v4 }
 0x4bf   : > { %v1246_v9 = vmax.f32 %v4010_v3, %v1220_v6  ;;  %v1222_v10 = vpop.xlane.xlu0 %1221 }
 0x4c0   : > { %v4028_v13 = vmax.f32 %v4017_v5, %v1222_v10  ;;  %v1281_v40 = vmul.f32 1.442695, %v1261_v36 }
 0x4c1   : > { %1824 = vst.msk [vmem:[#allocation5 + $0x28] sm:$0xff] %vm1513_vm1, %v1246_v9  ;;  %v1262_v50 = vsub.f32 %v4010_v3, %v1246_v9 }
 0x4c2   : > { %v1224_v15 = vpop.xlane.xlu1 %1223  ;;  %1317 = vperm.xlu1 %2985, %v4008_v0   ;;  %1825 = vst.msk [vmem:[#allocation5 + $0x30] sm:$0xff] %vm1513_vm1, %v4028_v13 }
 0x4c3   : > { %v1248_v28 = vmax.f32 %v4025_v12, %v1224_v15  ;;  %v1226_v35 = vpop.xlane.xlu0 %1225  ;;  %v1283_v6 = vmul.f32 1.442695, %v1262_v50 }
 0x4c4   : > { %v4040_v38 = vmax.f32 %v4031_v14, %v1226_v35 }
 0x4c5   : > { %1826 = vst.msk [vmem:[#allocation5 + $0x38] sm:$0xff] %vm1513_vm1, %v1248_v28  ;;  %v1264_v7 = vsub.f32 %v4025_v12, %v1248_v28  ;;  %2990 = vpow2.f32 %v1283_v6 }
 0x4c6   : > { %v1228_v41 = vpop.xlane.xlu1 %1227  ;;  %1332 = vperm.xlu1 %2985, %v1246_v9   ;;  %1827 = vst.msk [vmem:[#allocation5 + $0x40] sm:$0xff] %vm1513_vm1, %v4040_v38  ;;  %v1258_v9 = vsub.f32 %v3983_v51, %v3994_v58  ;;  %v1259_v51 = vsub.f32 %v3996_v59, %v4008_v0  ;;  %v4094_v58 = vpop.eup %2986 }
 0x4c7   : > { %v1250_v42 = vmax.f32 %v1202_v37, %v1228_v41  ;;  %v1230_v43 = vpop.xlane.xlu0 %1229  ;;  %v1287_v12 = vmul.f32 1.442695, %v1264_v7  ;;  %v1263_v41 = vsub.f32 %v4017_v5, %v4028_v13 }
 0x4c8   : > { %v4050_v45 = vmax.f32 %v4043_v39, %v1230_v43  ;;  %v1275_v16 = vmul.f32 1.442695, %v1258_v9  ;;  %v1277_v35 = vmul.f32 1.442695, %v1259_v51  ;;  %v1265_v43 = vsub.f32 %v4031_v14, %v4040_v38 }
 0x4c9   : > { %1828 = vst.msk [vmem:[#allocation5 + $0x48] sm:$0xff] %vm1513_vm1, %v1250_v42  ;;  %1352 = vperm.xlu0 %2984, %v1250_v42   ;;  %v1266_v15 = vsub.f32 %v1202_v37, %v1250_v42  ;;  %2992 = vpow2.f32 %v1287_v12  ;;  %v4100_v37 = vpop.eup %2988 }
 0x4ca   : > { %v1232_v49 = vpop.xlane.xlu1 %1231  ;;  %1327 = vperm.xlu1 %2985, %v4013_v4   ;;  %1829 = vst.msk [vmem:[#allocation5 + $0x50] sm:$0xff] %vm1513_vm1, %v4050_v45  ;;  %2994 = vpow2.f32 %v1275_v16  ;;  %v1285_v4 = vmul.f32 1.442695, %v1263_v41  ;;  %v1289_v5 = vmul.f32 1.442695, %v1265_v43 }
 0x4cb   : > { %v1252_v52 = vmax.f32 %v1204_v44, %v1232_v49  ;;  %v1234_v53 = vpop.xlane.xlu0 %1233  ;;  %v1291_v17 = vmul.f32 1.442695, %v1266_v15 }
 0x4cc   : > { %v4061_v56 = vmax.f32 %v4053_v46, %v1234_v53 }
 0x4cd   : > { %1830 = vst.msk [vmem:[#allocation5 + $0x58] sm:$0xff] %vm1513_vm1, %v1252_v52  ;;  %1362 = vperm.xlu0 %2984, %v1252_v52   ;;  %2996 = vpow2.f32 %v1291_v17 }
 0x4ce   : > { %v1236_v55 = vpop.xlane.xlu1 %1235  ;;  %1342 = vperm.xlu1 %2985, %v1248_v28   ;;  %1831 = vst.msk [vmem:[#allocation5 + $0x60] sm:$0xff] %vm1513_vm1, %v4061_v56  ;;  %v1268_v28 = vsub.f32 %v1204_v44, %v1252_v52  ;;  %2998 = vpow2.f32 %v1277_v35 }
 0x4cf   : > { %v1254_v62 = vmax.f32 %v1206_v54, %v1236_v55  ;;  %v1238_v63 = vpop.xlane.xlu0 %1237  ;;  %v4106_v42 = vpop.eup %2990 }
 0x4d0   : > { %v4072_v2 = vmax.f32 %v4064_v57, %v1238_v63  ;;  %v1295_v59 = vmul.f32 1.442695, %v1268_v28 }
 0x4d1   : > { %1832 = vst.msk [vmem:[#allocation5 + $0x68] sm:$0xff] %vm1513_vm1, %v1254_v62  ;;  %1372 = vperm.xlu0 %2984, %v1254_v62   ;;  %v1270_v0 = vsub.f32 %v1206_v54, %v1254_v62 }
 0x4d2   : > { %1337 = vperm.xlu1 %2985, %v4028_v13   ;;  %v1240_v3 = vpop.xlane.xlu1 %1239  ;;  %v1271_v8 = vsub.f32 %v4064_v57, %v4072_v2  ;;  %1833 = vst.msk [vmem:[#allocation5 + $0x70] sm:$0xff] %vm1513_vm1, %v4072_v2  ;;  %3000 = vpow2.f32 %v1295_v59  ;;  %v1267_v13 = vsub.f32 %v4043_v39, %v4050_v45 }
 0x4d3   : > { %v4084_v10 = vmax.f32 %v4069_v1, %v1240_v3  ;;  %v1299_v60 = vmul.f32 1.442695, %v1270_v0  ;;  %3002 = vpow2.f32 %v1281_v40  ;;  %v4112_v44 = vpop.eup %2992 }
 0x4d4   : > { %v4114_v48 = vpop.eup %2994  ;;  %v1293_v14 = vmul.f32 1.442695, %v1267_v13 }
 0x4d5   : > { %v1272_v11 = vsub.f32 %v4069_v1, %v4084_v10  ;;  %1834 = vst.msk [vmem:[#allocation5 + $0x78] sm:$0xff] %vm1513_vm1, %v4084_v10  ;;  %1382 = vperm.xlu0 %2984, %v4084_v10   ;;  %3004 = vpow2.f32 %v1299_v60 }
 0x4d6   : > { %1347 = vperm.xlu1 %2985, %v4040_v38   ;;  %3006 = vpow2.f32 %v1285_v4  ;;  %v1269_v38 = vsub.f32 %v4053_v46, %v4061_v56 }
 0x4d7   : > { %v4120_v47 = vpop.eup %2996  ;;  %3008 = vpow2.f32 %v1289_v5 }
 0x4d8   : > { %v4122_v49 = vpop.eup %2998  ;;  %3010 = vpow2.f32 %v1293_v14  ;;  %v1297_v39 = vmul.f32 1.442695, %v1269_v38 }
 0x4d9   : > { %1548 = vperm.xlu0 %2984, %v4094_v58  }
 0x4da   : > { %1357 = vperm.xlu1 %2985, %v4050_v45   ;;  %3012 = vpow2.f32 %v1297_v39 }
 0x4dc   : > { %v4128_v52 = vpop.eup %3000 }
 0x4dd   : > { %1563 = vperm.xlu0 %2984, %v4100_v37   ;;  %v4130_v53 = vpop.eup %3002 }
 0x4de   : > { %1367 = vperm.xlu1 %2985, %v4061_v56  }
 0x4df   : > { %v4134_v45 = vpop.eup %3004 }
 0x4e0   : > { %v4136_v54 = vpop.eup %3006 }
 0x4e1   : > { %1573 = vperm.xlu0 %2984, %v4106_v42   ;;  %v4140_v46 = vpop.eup %3008 }
 0x4e2   : > { %1377 = vperm.xlu1 %2985, %v4072_v2   ;;  %v4143_v56 = vpop.eup %3010 }
 0x4e4   : > { %v4146_v61 = vpop.eup %3012 }
 0x4e5   : > { %1583 = vperm.xlu0 %2984, %v4112_v44  }
 0x4e6   : > { %1553 = vperm.xlu1 %2985, %v4114_v48  }
 0x4e9   : > { %1593 = vperm.xlu0 %2984, %v4120_v47  }
 0x4ea   : > { %1558 = vperm.xlu1 %2985, %v4122_v49  }
 0x4ed   : > { %1603 = vperm.xlu0 %2984, %v4128_v52  }
 0x4ee   : > { %1568 = vperm.xlu1 %2985, %v4130_v53  }
 0x4f1   : > { %1613 = vperm.xlu0 %2984, %v4134_v45  }
 0x4f2   : > { %1578 = vperm.xlu1 %2985, %v4136_v54  }
 0x4f6   : > { %1588 = vperm.xlu1 %2985, %v4140_v46  }
 0x4fa   : > { %1598 = vperm.xlu1 %2985, %v4143_v56  }
 0x4fe   : > { %1608 = vperm.xlu1 %2985, %v4146_v61  }
 0x535   : > { %v1308_v50 = vpop.permute.xlu0 %1307 }
 0x536   : > { %v1385_v55 = vsub.f32 %v3918_v19, %v1308_v50 }
 0x538   : > { %v1401_v62 = vmul.f32 1.442695, %v1385_v55 }
 0x539   : > { %v1313_v63 = vpop.permute.xlu1 %1312 }
 0x53a   : > { %3014 = vpow2.f32 %v1401_v62  ;;  %v1386_v6 = vsub.f32 %v3916_v18, %v1313_v63 }
 0x53c   : > { %v1403_v7 = vmul.f32 1.442695, %v1386_v6 }
 0x53d   : > { %v1323_v3 = vpop.permute.xlu1 %1322 }
 0x53e   : > { %3016 = vpow2.f32 %v1403_v7  ;;  %v1388_v9 = vsub.f32 %v3921_v20, %v1323_v3 }
 0x540   : > { %v1407_v12 = vmul.f32 1.442695, %v1388_v9 }
 0x541   : > { %v1318_v15 = vpop.permute.xlu1 %1317 }
 0x542   : > { %3018 = vpow2.f32 %v1407_v12  ;;  %v1387_v16 = vsub.f32 %v3924_v21, %v1318_v15 }
 0x544   : > { %v3015_v51 = vpop.eup %3014  ;;  %v1405_v17 = vmul.f32 1.442695, %v1387_v16 }
 0x545   : > { %v1333_v28 = vpop.permute.xlu1 %1332  ;;  %1465 = vadd.xlane.f32.xlu1 %v3015_v51  ;;  %2622 = vmatprep.mubr.f32.mxu1 %v3015_v51 }
 0x546   : > { %3020 = vpow2.f32 %v1405_v17  ;;  %v1390_v19 = vsub.f32 %v3927_v22, %v1333_v28 }
 0x548   : > { %v3017_v35 = vpop.eup %3016  ;;  %v1411_v18 = vmul.f32 1.442695, %v1390_v19  ;;  %v1353_v36 = vpop.permute.xlu0 %1352 }
 0x549   : > { %v1328_v59 = vpop.permute.xlu1 %1327  ;;  %1467 = vadd.xlane.f32.xlu0 %v3017_v35  ;;  %2623 = vmatmul.mubr.f32.vlgmr.msra.gmra.mrb[0].mxu1 %v3017_v35  ;;  %v1394_v4 = vsub.f32 %v3939_v26, %v1353_v36 }
 0x54a   : > { %3022 = vpow2.f32 %v1411_v18  ;;  %v1389_v20 = vsub.f32 %v3930_v23, %v1328_v59 }
 0x54b   : > { %v1419_v23 = vmul.f32 1.442695, %v1394_v4 }
 0x54c   : > { %v3019_v0 = vpop.eup %3018  ;;  %v1409_v40 = vmul.f32 1.442695, %v1389_v20  ;;  %v1363_v21 = vpop.permute.xlu0 %1362 }
 0x54d   : > { %v1343_v41 = vpop.permute.xlu1 %1342  ;;  %1471 = vadd.xlane.f32.xlu1 %v3019_v0  ;;  %v1396_v38 = vsub.f32 %v3945_v29, %v1363_v21 }
 0x54e   : > { %3024 = vpow2.f32 %v1409_v40  ;;  %v1392_v60 = vsub.f32 %v3933_v24, %v1343_v41  ;;  %v1303_v40 = vmul.f32 1.442695, %v1272_v11 }
 0x54f   : > { %v1423_v26 = vmul.f32 1.442695, %v1396_v38 }
 0x550   : > { %v3021_v22 = vpop.eup %3020  ;;  %v1415_v43 = vmul.f32 1.442695, %v1392_v60  ;;  %v1373_v13 = vpop.permute.xlu0 %1372 }
 0x551   : > { %v1338_v5 = vpop.permute.xlu1 %1337  ;;  %1469 = vadd.xlane.f32.xlu0 %v3021_v22  ;;  %2625 = vmatprep.mubr.f32.mxu1 %v3021_v22  ;;  %v1398_v62 = vsub.f32 %v3951_v31, %v1373_v13 }
 0x552   : > { %3026 = vpow2.f32 %v1415_v43  ;;  %v1391_v14 = vsub.f32 %v3936_v25, %v1338_v5  ;;  %2626 = vmatmul.mubr.f32.gmra.mrb[2].mxu1 %v3019_v0  ;;  %v1301_v0 = vmul.f32 1.442695, %v1271_v8 }
 0x553   : > { %v1427_v29 = vmul.f32 1.442695, %v1398_v62 }
 0x554   : > { %v3023_v39 = vpop.eup %3022  ;;  %v1413_v50 = vmul.f32 1.442695, %v1391_v14  ;;  %v1383_v6 = vpop.permute.xlu0 %1382 }
 0x555   : > { %v1348_v55 = vpop.permute.xlu1 %1347  ;;  %1475 = vadd.xlane.f32.xlu1 %v3023_v39  ;;  %v1400_v9 = vsub.f32 %v3957_v33, %v1383_v6 }
 0x556   : > { %3028 = vpow2.f32 %v1413_v50  ;;  %v1393_v24 = vsub.f32 %v3942_v27, %v1348_v55  ;;  %v1434_v55 = vld [vmem:[#allocation6 + $0x8] sm:$0xff] }
 0x557   : > { %3030 = vpow2.f32 %v1419_v23  ;;  %v1431_v16 = vmul.f32 1.442695, %v1400_v9  ;;  %v1433_v23 = vld [vmem:[#allocation6] sm:$0xff] }
 0x558   : > { %v3025_v63 = vpop.eup %3024  ;;  %v1417_v7 = vmul.f32 1.442695, %v1393_v24  ;;  %v4179_v57 = vpop.permute.xlu0 %1548  ;;  %v1449_v38 = vmul.f32 %v4094_v58, %v1433_v23  ;;  %v1443_v23 = vld [vmem:[#allocation6 + $0x50] sm:$0xff] }
 0x559   : > { %v1358_v3 = vpop.permute.xlu1 %1357  ;;  %1473 = vadd.xlane.f32.xlu0 %v3025_v63  ;;  %2628 = vmatprep.mubr.f32.mxu1 %v3025_v63  ;;  %v1436_v63 = vld [vmem:[#allocation6 + $0x18] sm:$0xff] }
 0x55a   : > { %3032 = vpow2.f32 %v1417_v7  ;;  %v1395_v25 = vsub.f32 %v3948_v30, %v1358_v3  ;;  %2629 = vmatmul.mubr.f32.gmra.mrb[4].mxu1 %v3023_v39  ;;  %v1452_v7 = vmul.f32 %v4100_v37, %v1436_v63 }
 0x55b   : > { %3034 = vpow2.f32 %v1423_v26  ;;  %v1450_v26 = vmul.f32 %v4114_v48, %v1434_v55  ;;  %v1459_v55 = vmul.f32 %v4143_v56, %v1443_v23  ;;  %v1447_v56 = vld [vmem:[#allocation6 + $0x70] sm:$0xff] }
 0x55c   : > { %v3027_v12 = vpop.eup %3026  ;;  %v1421_v27 = vmul.f32 1.442695, %v1395_v25  ;;  %v4183_v8 = vpop.permute.xlu0 %1563  ;;  %v1435_v25 = vld [vmem:[#allocation6 + $0x10] sm:$0xff] }
 0x55d   : > { %v1368_v15 = vpop.permute.xlu1 %1367  ;;  %1479 = vadd.xlane.f32.xlu1 %v3027_v12  ;;  %v1451_v58 = vmul.f32 %v4122_v49, %v1435_v25 }
 0x55e   : > { %3036 = vpow2.f32 %v1421_v27  ;;  %v1397_v31 = vsub.f32 %v3954_v32, %v1368_v15 }
 0x55f   : > { %3038 = vpow2.f32 %v1427_v29 }
 0x560   : > { %v3029_v51 = vpop.eup %3028  ;;  %v1425_v17 = vmul.f32 1.442695, %v1397_v31  ;;  %v4187_v1 = vpop.permute.xlu0 %1573  ;;  %v1437_v31 = vld [vmem:[#allocation6 + $0x20] sm:$0xff] }
 0x561   : > { %v3031_v28 = vpop.eup %3030  ;;  %1477 = vadd.xlane.f32.xlu0 %v3029_v51  ;;  %v1378_v19 = vpop.permute.xlu1 %1377  ;;  %2631 = vmatprep.mubr.f32.mxu1 %v3029_v51  ;;  %v1453_v37 = vmul.f32 %v4130_v53, %v1437_v31 }
 0x562   : > { %3040 = vpow2.f32 %v1425_v17  ;;  %v1399_v30 = vsub.f32 %v3960_v34, %v1378_v19  ;;  %1483 = vadd.xlane.f32.xlu1 %v3031_v28  ;;  %2632 = vmatmul.mubr.f32.gmra.mrb[6].mxu1 %v3027_v12  ;;  %v1438_v12 = vld [vmem:[#allocation6 + $0x28] sm:$0xff]  ;;  %v1440_v17 = vld [vmem:[#allocation6 + $0x38] sm:$0xff] }
 0x563   : > { %3042 = vpow2.f32 %v1431_v16  ;;  %v1454_v48 = vmul.f32 %v4106_v42, %v1438_v12  ;;  %v1456_v49 = vmul.f32 %v4112_v44, %v1440_v17  ;;  %v1533_v17 = vld [vmem:[#allocation7 + $0x18] sm:$0xff] }
 0x564   : > { %v3033_v33 = vpop.eup %3032  ;;  %v1429_v35 = vmul.f32 1.442695, %v1399_v30  ;;  %v4191_v11 = vpop.permute.xlu0 %1583  ;;  %v1439_v30 = vld [vmem:[#allocation6 + $0x30] sm:$0xff] }
 0x565   : > { %v3035_v18 = vpop.eup %3034  ;;  %1481 = vadd.xlane.f32.xlu0 %v3033_v33  ;;  %2634 = vmatprep.mubr.f32.mxu1 %v3033_v33  ;;  %v4177_v60 = vpop.permute.xlu1 %1553  ;;  %v1455_v42 = vmul.f32 %v4136_v54, %v1439_v30 }
 0x566   : > { %3044 = vpow2.f32 %v1429_v35  ;;  %1487 = vadd.xlane.f32.xlu1 %v3035_v18  ;;  %2635 = vmatmul.mubr.f32.gmra.mrb[8].mxu1 %v3031_v28  ;;  %v1442_v35 = vld [vmem:[#allocation6 + $0x48] sm:$0xff] }
 0x567   : > { %3046 = vpow2.f32 %v1301_v0 }
 0x568   : > { %v3037_v32 = vpop.eup %3036  ;;  %3048 = vpow2.f32 %v1303_v40  ;;  %v4195_v43 = vpop.permute.xlu0 %1593 }
 0x569   : > { %v3039_v36 = vpop.eup %3038  ;;  %1485 = vadd.xlane.f32.xlu0 %v3037_v32  ;;  %2637 = vmatprep.mubr.f32.mxu1 %v3037_v32  ;;  %v4181_v2 = vpop.permute.xlu1 %1558 }
 0x56a   : > { %1491 = vadd.xlane.f32.xlu1 %v3039_v36  ;;  %2638 = vmatmul.mubr.f32.gmra.mrb[10].mxu1 %v3035_v18  ;;  %v1458_v18 = vmul.f32 %v4120_v47, %v1442_v35 }
 0x56c   : > { %v3041_v59 = vpop.eup %3040  ;;  %v4199_v13 = vpop.permute.xlu0 %1603 }
 0x56d   : > { %v3043_v20 = vpop.eup %3042  ;;  %1489 = vadd.xlane.f32.xlu0 %v3041_v59  ;;  %2640 = vmatprep.mubr.f32.mxu1 %v3041_v59  ;;  %v4185_v4 = vpop.permute.xlu1 %1568 }
 0x56e   : > { %1495 = vadd.xlane.f32.xlu1 %v3043_v20  ;;  %2641 = vmatmul.mubr.f32.gmra.mrb[12].mxu1 %v3039_v36  ;;  %v1441_v36 = vld [vmem:[#allocation6 + $0x40] sm:$0xff] }
 0x56f   : > { %v1457_v44 = vmul.f32 %v4140_v46, %v1441_v36  ;;  %v1445_v46 = vld [vmem:[#allocation6 + $0x60] sm:$0xff] }
 0x570   : > { %v3045_v34 = vpop.eup %3044  ;;  %v4204_v39 = vpop.permute.xlu0 %1613 }
 0x571   : > { %1493 = vadd.xlane.f32.xlu0 %v3045_v34  ;;  %2643 = vmatprep.mubr.f32.mxu1 %v3045_v34  ;;  %v4171_v21 = vpop.eup %3046  ;;  %v4189_v10 = vpop.permute.xlu1 %1578 }
 0x572   : > { %2644 = vmatmul.mubr.f32.gmra.mrb[14].mxu1 %v3043_v20  ;;  %v4174_v41 = vpop.eup %3048  ;;  %v1444_v20 = vld [vmem:[#allocation6 + $0x58] sm:$0xff] }
 0x573   : > { %v1460_v0 = vmul.f32 %v4128_v52, %v1444_v20 }
 0x575   : > { %v4193_v22 = vpop.permute.xlu1 %1588 }
 0x579   : > { %v4197_v5 = vpop.permute.xlu1 %1598 }
 0x57d   : > { %v4201_v14 = vpop.permute.xlu1 %1608 }
 0x57f   : > { %1618 = vperm.xlu1 %2985, %v4171_v21  }
 0x587   : > { %1623 = vperm.xlu0 %2984, %v4174_v41  }
 0x5d2   : > { %v1466_v50 = vpop.xlane.xlu1 %1465 }
 0x5d3   : > { %v1497_v24 = vadd.f32 %v1466_v50, %v1449_v38  ;;  %v1446_v50 = vld [vmem:[#allocation6 + $0x68] sm:$0xff] }
 0x5d5   : > { %1514 = vst.msk [vmem:[#allocation6] sm:$0xff] %vm1513_vm1, %v1497_v24  ;;  %v1462_v24 = vmul.f32 %v4134_v45, %v1446_v50  ;;  %v1463_v45 = vmul.f32 %v4171_v21, %v1447_v56  ;;  %v1532_v21 = vld [vmem:[#allocation7 + $0x10] sm:$0xff] }
 0x5d6   : > { %v1468_v62 = vpop.xlane.xlu0 %1467 }
 0x5d7   : > { %v1498_v6 = vadd.f32 %v1468_v62, %v1450_v26 }
 0x5d9   : > { %1515 = vst.msk [vmem:[#allocation6 + $0x8] sm:$0xff] %vm1513_vm1, %v1498_v6  ;;  %v1448_v6 = vld [vmem:[#allocation6 + $0x78] sm:$0xff] }
 0x5da   : > { %v1472_v3 = vpop.xlane.xlu1 %1471 }
 0x5db   : > { %v1500_v29 = vadd.f32 %v1472_v3, %v1452_v7  ;;  %v1461_v7 = vmul.f32 %v4146_v61, %v1445_v46  ;;  %v1464_v3 = vmul.f32 %v4174_v41, %v1448_v6  ;;  %v1531_v61 = vld [vmem:[#allocation7 + $0x8] sm:$0xff]  ;;  %v1542_v6 = vld [vmem:[#allocation7 + $0x60] sm:$0xff] }
 0x5dd   : > { %1517 = vst.msk [vmem:[#allocation6 + $0x18] sm:$0xff] %vm1513_vm1, %v1500_v29 }
 0x5de   : > { %v1470_v9 = vpop.xlane.xlu0 %1469 }
 0x5df   : > { %v1499_v27 = vadd.f32 %v1470_v9, %v1451_v58 }
 0x5e1   : > { %1516 = vst.msk [vmem:[#allocation6 + $0x10] sm:$0xff] %vm1513_vm1, %v1499_v27 }
 0x5e2   : > { %v1476_v15 = vpop.xlane.xlu1 %1475 }
 0x5e3   : > { %v1502_v16 = vadd.f32 %v1476_v15, %v1454_v48  ;;  %v1530_v48 = vld [vmem:[#allocation7] sm:$0xff]  ;;  %v1627_v15 = vmul.f32 %v4177_v60, %v1531_v61  ;;  %v1535_v60 = vld [vmem:[#allocation7 + $0x28] sm:$0xff] }
 0x5e4   : > { %v1626_v41 = vmul.f32 %v4179_v57, %v1530_v48  ;;  %v1534_v57 = vld [vmem:[#allocation7 + $0x20] sm:$0xff] }
 0x5e5   : > { %1519 = vst.msk [vmem:[#allocation6 + $0x28] sm:$0xff] %vm1513_vm1, %v1502_v16 }
 0x5e6   : > { %v1474_v51 = vpop.xlane.xlu0 %1473 }
 0x5e7   : > { %v1501_v28 = vadd.f32 %v1474_v51, %v1453_v37 }
 0x5e9   : > { %1518 = vst.msk [vmem:[#allocation6 + $0x20] sm:$0xff] %vm1513_vm1, %v1501_v28  ;;  %v1629_v28 = vmul.f32 %v4183_v8, %v1533_v17  ;;  %v1537_v8 = vld [vmem:[#allocation7 + $0x38] sm:$0xff] }
 0x5ea   : > { %v1480_v19 = vpop.xlane.xlu1 %1479  ;;  %v1633_v20 = vmul.f32 %v4191_v11, %v1537_v8 }
 0x5eb   : > { %v1504_v33 = vadd.f32 %v1480_v19, %v1456_v49  ;;  %v1628_v49 = vmul.f32 %v4181_v2, %v1532_v21  ;;  %v1536_v2 = vld [vmem:[#allocation7 + $0x30] sm:$0xff] }
 0x5ed   : > { %1521 = vst.msk [vmem:[#allocation6 + $0x38] sm:$0xff] %vm1513_vm1, %v1504_v33 }
 0x5ee   : > { %v1478_v32 = vpop.xlane.xlu0 %1477 }
 0x5ef   : > { %v1484_v53 = vpop.xlane.xlu1 %1483  ;;  %v1503_v59 = vadd.f32 %v1478_v32, %v1455_v42  ;;  %v1631_v42 = vmul.f32 %v4187_v1, %v1535_v60 }
 0x5f0   : > { %v1506_v34 = vadd.f32 %v1484_v53, %v1458_v18  ;;  %v1630_v18 = vmul.f32 %v4185_v4, %v1534_v57  ;;  %v1843_v17 = vld [vmem:[#allocation6 + $0x20] sm:$0xff] (!%p2199_p1) }
 0x5f1   : > { %1520 = vst.msk [vmem:[#allocation6 + $0x30] sm:$0xff] %vm1513_vm1, %v1503_v59 }
 0x5f2   : > { %1523 = vst.msk [vmem:[#allocation6 + $0x48] sm:$0xff] %vm1513_vm1, %v1506_v34  ;;  %v1482_v40 = vpop.xlane.xlu0 %1481  ;;  %v1539_v34 = vld [vmem:[#allocation7 + $0x48] sm:$0xff] }
 0x5f3   : > { %v1488_v38 = vpop.xlane.xlu1 %1487  ;;  %v1505_v54 = vadd.f32 %v1482_v40, %v1457_v44  ;;  %v1632_v44 = vmul.f32 %v4189_v10, %v1536_v2  ;;  %v1538_v40 = vld [vmem:[#allocation7 + $0x40] sm:$0xff]  ;;  %v1635_v4 = vmul.f32 %v4195_v43, %v1539_v34  ;;  %v1543_v10 = vld [vmem:[#allocation7 + $0x68] sm:$0xff] }
 0x5f4   : > { %v1508_v47 = vadd.f32 %v1488_v38, %v1460_v0  ;;  %v1634_v50 = vmul.f32 %v4193_v22, %v1538_v40  ;;  %v1639_v22 = vmul.f32 %v4204_v39, %v1543_v10  ;;  %v1846_v21 = vld [vmem:[#allocation6 + $0x38] sm:$0xff] (!%p2199_p1) }
 0x5f5   : > { %1522 = vst.msk [vmem:[#allocation6 + $0x40] sm:$0xff] %vm1513_vm1, %v1505_v54  ;;  %v1541_v54 = vld [vmem:[#allocation7 + $0x58] sm:$0xff] }
 0x5f6   : > { %1525 = vst.msk [vmem:[#allocation6 + $0x58] sm:$0xff] %vm1513_vm1, %v1508_v47  ;;  %v1486_v26 = vpop.xlane.xlu0 %1485  ;;  %v1637_v46 = vmul.f32 %v4199_v13, %v1541_v54  ;;  %v1544_v13 = vld [vmem:[#allocation7 + $0x70] sm:$0xff] }
 0x5f7   : > { %v1492_v62 = vpop.xlane.xlu1 %1491  ;;  %v1507_v63 = vadd.f32 %v1486_v26, %v1459_v55  ;;  %v1540_v55 = vld [vmem:[#allocation7 + $0x50] sm:$0xff] }
 0x5f8   : > { %v1510_v52 = vadd.f32 %v1492_v62, %v1462_v24  ;;  %v1636_v62 = vmul.f32 %v4197_v5, %v1540_v55 }
 0x5f9   : > { %1524 = vst.msk [vmem:[#allocation6 + $0x50] sm:$0xff] %vm1513_vm1, %v1507_v63 }
 0x5fa   : > { %1527 = vst.msk [vmem:[#allocation6 + $0x68] sm:$0xff] %vm1513_vm1, %v1510_v52  ;;  %v1490_v25 = vpop.xlane.xlu0 %1489 }
 0x5fb   : > { %v1496_v29 = vpop.xlane.xlu1 %1495  ;;  %v1509_v58 = vadd.f32 %v1490_v25, %v1461_v7  ;;  %v1545_v25 = vld [vmem:[#allocation7 + $0x78] sm:$0xff] }
 0x5fc   : > { %v1512_v9 = vadd.f32 %v1496_v29, %v1464_v3  ;;  %v1638_v3 = vmul.f32 %v4201_v14, %v1542_v6  ;;  %v1841_v14 = vld [vmem:[#allocation6 + $0x10] sm:$0xff] (!%p2199_p1) }
 0x5fd   : > { %1526 = vst.msk [vmem:[#allocation6 + $0x60] sm:$0xff] %vm1513_vm1, %v1509_v58  ;;  %3052 = vrcp.f32 (!%p2199_p1), %v1841_v14  ;;  %v1850_v57 = vld [vmem:[#allocation6 + $0x58] sm:$0xff] (!%p2199_p1) }
 0x5fe   : > { %1529 = vst.msk [vmem:[#allocation6 + $0x78] sm:$0xff] %vm1513_vm1, %v1512_v9  ;;  %v1494_v12 = vpop.xlane.xlu0 %1493 }
 0x5ff   : > { %v1511_v27 = vadd.f32 %v1494_v12, %v1463_v45  ;;  %v1619_v58 = vpop.permute.xlu1 %1618 }
 0x601   : > { %1528 = vst.msk [vmem:[#allocation6 + $0x70] sm:$0xff] %vm1513_vm1, %v1511_v27  ;;  %v1640_v27 = vmul.f32 %v1619_v58, %v1544_v13 }
 0x605   : > { %v1854_v2 = vld [vmem:[#allocation6 + $0x78] sm:$0xff] (!%p2199_p1) }
 0x606   : > { %v1624_v56 = vpop.permute.xlu0 %1623 }
 0x607   : > { %v1641_v12 = vmul.f32 %v1624_v56, %v1545_v25 }
 0x608   : > { %v1853_v34 = vld [vmem:[#allocation6 + $0x70] sm:$0xff] (!%p2199_p1) }
 0x61c   : > { %v2624_v31 = vpop.f32.mrb[0].mxu1 }
 0x61d   : > { %v1788_v16 = vadd.f32 %v2624_v31, %v1627_v15  ;;  %v1708_v37 = vpop.f32.mrb[1].mxu1  ;;  %v1842_v31 = vld [vmem:[#allocation6 + $0x18] sm:$0xff] (!%p2199_p1) }
 0x61e   : > { %v1787_v51 = vadd.f32 %v1708_v37, %v1626_v41  ;;  %v1839_v41 = vld [vmem:[#allocation6] sm:$0xff] (!%p2199_p1)  ;;  %v1840_v37 = vld [vmem:[#allocation6 + $0x8] sm:$0xff] (!%p2199_p1) }
 0x61f   : > { %1804 = vst [vmem:[#allocation7 + $0x8] sm:$0xff] %v1788_v16  ;;  %v3390_v16 = vmov (!%p2199_p1), 0   ;;  %3054 = vrcp.f32 (!%p2199_p1), %v1839_v41 }
 0x620   : > { %1803 = vst [vmem:[#allocation7] sm:$0xff] %v1787_v51  ;;  %3051 = vset.pattern.permute.xlu1 (!%p2199_p1), %v3390_v16  ;;  %3050 = vset.pattern.permute.xlu0 (!%p2199_p1), %v3390_v16  ;;  %3056 = vrcp.f32 (!%p2199_p1), %v1842_v31  ;;  %v1844_v51 = vld [vmem:[#allocation6 + $0x28] sm:$0xff] (!%p2199_p1) }
 0x621   : > { %3058 = vrcp.f32 (!%p2199_p1), %v1840_v37 }
 0x622   : > { %3060 = vrcp.f32 (!%p2199_p1), %v1844_v51 }
 0x623   : > { %3062 = vrcp.f32 (!%p2199_p1), %v1843_v17 }
 0x624   : > { %3064 = vrcp.f32 (!%p2199_p1), %v1846_v21 }
 0x625   : > { %v2627_v19 = vpop.f32.mrb[2].mxu1 }
 0x626   : > { %v1790_v30 = vadd.f32 %v2627_v19, %v1629_v28  ;;  %v1718_v33 = vpop.f32.mrb[3].mxu1  ;;  %v1845_v28 = vld [vmem:[#allocation6 + $0x30] sm:$0xff] (!%p2199_p1) }
 0x627   : > { %v1789_v35 = vadd.f32 %v1718_v33, %v1628_v49  ;;  %v3053_v49 = vpop.eup (!%p2199_p1), %3052  ;;  %3066 = vrcp.f32 (!%p2199_p1), %v1845_v28 }
 0x628   : > { %1806 = vst [vmem:[#allocation7 + $0x18] sm:$0xff] %v1790_v30  ;;  %1899 = vperm.xlu1 (!%p2199_p1), %3051, %v3053_v49   ;;  %v1848_v30 = vld [vmem:[#allocation6 + $0x48] sm:$0xff] (!%p2199_p1) }
 0x629   : > { %1805 = vst [vmem:[#allocation7 + $0x10] sm:$0xff] %v1789_v35  ;;  %v3055_v19 = vpop.eup (!%p2199_p1), %3054  ;;  %v1847_v35 = vld [vmem:[#allocation6 + $0x40] sm:$0xff] (!%p2199_p1)  ;;  %3068 = vrcp.f32 (!%p2199_p1), %v1848_v30 }
 0x62a   : > { %v3057_v33 = vpop.eup (!%p2199_p1), %3056  ;;  %1889 = vperm.xlu0 (!%p2199_p1), %3050, %v3055_v19   ;;  %3070 = vrcp.f32 (!%p2199_p1), %v1847_v35 }
 0x62b   : > { %v3059_v60 = vpop.eup (!%p2199_p1), %3058  ;;  %3072 = vrcp.f32 (!%p2199_p1), %v1850_v57 }
 0x62c   : > { %1904 = vperm.xlu1 (!%p2199_p1), %3051, %v3057_v33  }
 0x62d   : > { %v2630_v32 = vpop.f32.mrb[4].mxu1 }
 0x62e   : > { %v1792_v36 = vadd.f32 %v2630_v32, %v1631_v42  ;;  %v1728_v53 = vpop.f32.mrb[5].mxu1  ;;  %v3061_v42 = vpop.eup (!%p2199_p1), %3060  ;;  %1894 = vperm.xlu0 (!%p2199_p1), %3050, %v3059_v60  }
 0x62f   : > { %v1791_v59 = vadd.f32 %v1728_v53, %v1630_v18  ;;  %v1849_v18 = vld [vmem:[#allocation6 + $0x50] sm:$0xff] (!%p2199_p1)  ;;  %v3063_v32 = vpop.eup (!%p2199_p1), %3062 }
 0x630   : > { %1808 = vst [vmem:[#allocation7 + $0x28] sm:$0xff] %v1792_v36  ;;  %1914 = vperm.xlu1 (!%p2199_p1), %3051, %v3061_v42   ;;  %3074 = vrcp.f32 (!%p2199_p1), %v1849_v18  ;;  %v1852_v36 = vld [vmem:[#allocation6 + $0x68] sm:$0xff] (!%p2199_p1)  ;;  %v3065_v53 = vpop.eup (!%p2199_p1), %3064  ;;  %v1873_v54 = vld [vmem:[#allocation7 + $0x10] sm:$0xff] (!%p2199_p1) }
 0x631   : > { %1807 = vst [vmem:[#allocation7 + $0x20] sm:$0xff] %v1791_v59  ;;  %v1851_v59 = vld [vmem:[#allocation6 + $0x60] sm:$0xff] (!%p2199_p1)  ;;  %v3067_v8 = vpop.eup (!%p2199_p1), %3066  ;;  %3076 = vrcp.f32 (!%p2199_p1), %v1852_v36 }
 0x632   : > { %1909 = vperm.xlu0 (!%p2199_p1), %3050, %v3063_v32   ;;  %3078 = vrcp.f32 (!%p2199_p1), %v1851_v59 }
 0x633   : > { %3080 = vrcp.f32 (!%p2199_p1), %v1854_v2 }
 0x634   : > { %1924 = vperm.xlu1 (!%p2199_p1), %3051, %v3065_v53   ;;  %3082 = vrcp.f32 (!%p2199_p1), %v1853_v34 }
 0x635   : > { %v2633_v0 = vpop.f32.mrb[6].mxu1 }
 0x636   : > { %v1794_v23 = vadd.f32 %v2633_v0, %v1633_v20  ;;  %v1738_v38 = vpop.f32.mrb[7].mxu1  ;;  %v3069_v20 = vpop.eup (!%p2199_p1), %3068  ;;  %1919 = vperm.xlu0 (!%p2199_p1), %3050, %v3067_v8  }
 0x637   : > { %v1793_v1 = vadd.f32 %v1738_v38, %v1632_v44  ;;  %v3071_v44 = vpop.eup (!%p2199_p1), %3070 }
 0x638   : > { %1810 = vst [vmem:[#allocation7 + $0x38] sm:$0xff] %v1794_v23  ;;  %1934 = vperm.xlu1 (!%p2199_p1), %3051, %v3069_v20   ;;  %v3073_v0 = vpop.eup (!%p2199_p1), %3072 }
 0x639   : > { %1809 = vst [vmem:[#allocation7 + $0x30] sm:$0xff] %v1793_v1  ;;  %v2636_v47 = vpop.f32.mrb[8].mxu1 }
 0x63a   : > { %v1796_v24 = vadd.f32 %v2636_v47, %v1635_v4  ;;  %v1748_v26 = vpop.f32.mrb[9].mxu1  ;;  %1929 = vperm.xlu0 (!%p2199_p1), %3050, %v3071_v44   ;;  %v3075_v40 = vpop.eup (!%p2199_p1), %3074 }
 0x63b   : > { %v1795_v11 = vadd.f32 %v1748_v26, %v1634_v50  ;;  %v3077_v23 = vpop.eup (!%p2199_p1), %3076  ;;  %v1871_v50 = vld [vmem:[#allocation7] sm:$0xff] (!%p2199_p1) }
 0x63c   : > { %1812 = vst [vmem:[#allocation7 + $0x48] sm:$0xff] %v1796_v24  ;;  %1944 = vperm.xlu1 (!%p2199_p1), %3051, %v3073_v0   ;;  %v3079_v38 = vpop.eup (!%p2199_p1), %3078 }
 0x63d   : > { %1811 = vst [vmem:[#allocation7 + $0x40] sm:$0xff] %v1795_v11  ;;  %v2639_v63 = vpop.f32.mrb[10].mxu1  ;;  %v3081_v1 = vpop.eup (!%p2199_p1), %3080  ;;  %v1874_v11 = vld [vmem:[#allocation7 + $0x18] sm:$0xff] (!%p2199_p1) }
 0x63e   : > { %v1798_v43 = vadd.f32 %v2639_v63, %v1637_v46  ;;  %v1758_v52 = vpop.f32.mrb[11].mxu1  ;;  %1939 = vperm.xlu0 (!%p2199_p1), %3050, %v3075_v40   ;;  %v3083_v4 = vpop.eup (!%p2199_p1), %3082  ;;  %v1872_v46 = vld [vmem:[#allocation7 + $0x8] sm:$0xff] (!%p2199_p1) }
 0x63f   : > { %v1797_v7 = vadd.f32 %v1758_v52, %v1636_v62  ;;  %v1875_v52 = vld [vmem:[#allocation7 + $0x20] sm:$0xff] (!%p2199_p1)  ;;  %v1878_v56 = vld [vmem:[#allocation7 + $0x38] sm:$0xff] (!%p2199_p1) }
 0x640   : > { %1814 = vst [vmem:[#allocation7 + $0x58] sm:$0xff] %v1798_v43  ;;  %1954 = vperm.xlu1 (!%p2199_p1), %3051, %v3077_v23   ;;  %v1876_v43 = vld [vmem:[#allocation7 + $0x28] sm:$0xff] (!%p2199_p1) }
 0x641   : > { %1813 = vst [vmem:[#allocation7 + $0x50] sm:$0xff] %v1797_v7  ;;  %v2642_v29 = vpop.f32.mrb[12].mxu1 }
 0x642   : > { %v1800_v9 = vadd.f32 %v2642_v29, %v1639_v22  ;;  %v1768_v45 = vpop.f32.mrb[13].mxu1  ;;  %1949 = vperm.xlu0 (!%p2199_p1), %3050, %v3079_v38   ;;  %v1877_v29 = vld [vmem:[#allocation7 + $0x30] sm:$0xff] (!%p2199_p1) }
 0x643   : > { %v1799_v5 = vadd.f32 %v1768_v45, %v1638_v3  ;;  %1838 = sbr.rel (%p2199_p1) target bundleno = 1737 (0x6c9), region = 72 }
 0x644   : > { %1816 = vst [vmem:[#allocation7 + $0x68] sm:$0xff] %v1800_v9  ;;  %1964 = vperm.xlu1 (!%p2199_p1), %3051, %v3081_v1  }
 0x645   : > { %1815 = vst [vmem:[#allocation7 + $0x60] sm:$0xff] %v1799_v5  ;;  %v2645_v61 = vpop.f32.mrb[14].mxu1  ;;  %v1880_v5 = vld [vmem:[#allocation7 + $0x48] sm:$0xff] (!%p2199_p1) }
 0x646   : > { %v1802_v48 = vadd.f32 %v2645_v61, %v1641_v12  ;;  %v1778_v15 = vpop.f32.mrb[15].mxu1  ;;  %1959 = vperm.xlu0 (!%p2199_p1), %3050, %v3083_v4   ;;  %v1879_v12 = vld [vmem:[#allocation7 + $0x40] sm:$0xff] (!%p2199_p1) }
 0x647   : > { %v1801_v39 = vadd.f32 %v1778_v15, %v1640_v27 }
 0x648   : > { %1818 = vst [vmem:[#allocation7 + $0x78] sm:$0xff] %v1802_v48  ;;  %v1881_v14 = vld [vmem:[#allocation7 + $0x50] sm:$0xff] (!%p2199_p1) }
 0x649   : > { %1817 = vst [vmem:[#allocation7 + $0x70] sm:$0xff] %v1801_v39  ;;  %v1882_v39 = vld [vmem:[#allocation7 + $0x58] sm:$0xff] (!%p2199_p1) }
 0x64b   : > { %v1884_v51 = vld [vmem:[#allocation7 + $0x68] sm:$0xff] }
 0x64c   : > { %v1883_v17 = vld [vmem:[#allocation7 + $0x60] sm:$0xff] }
 0x64f   : > { %v1886_v30 = vld [vmem:[#allocation7 + $0x78] sm:$0xff] }
 0x650   : > { %v1885_v33 = vld [vmem:[#allocation7 + $0x70] sm:$0xff] }
 0x6a7   : > { %v1900_v47 = vpop.permute.xlu1 %1899 }
 0x6a8   : > { %v1969_v55 = vmul.f32 %v1900_v47, %v1873_v54 }
 0x6a9   : > { %v1890_v24 = vpop.permute.xlu0 %1889 }
 0x6aa   : > { %v1967_v26 = vmul.f32 %v1890_v24, %v1871_v50  ;;  %1985 = vst [vmem:[%s3790_s8 + $0x10] sm:$0xff] %v1969_v55 }
 0x6ab   : > { %v1905_v10 = vpop.permute.xlu1 %1904 }
 0x6ac   : > { %1983 = vst [vmem:[%s3790_s8] sm:$0xff] %v1967_v26  ;;  %v1970_v62 = vmul.f32 %v1905_v10, %v1874_v11 }
 0x6ad   : > { %v1895_v63 = vpop.permute.xlu0 %1894 }
 0x6ae   : > { %v1968_v6 = vmul.f32 %v1895_v63, %v1872_v46  ;;  %1986 = vst [vmem:[%s3790_s8 + $0x18] sm:$0xff] %v1970_v62 }
 0x6af   : > { %v1915_v7 = vpop.permute.xlu1 %1914 }
 0x6b0   : > { %1984 = vst [vmem:[%s3790_s8 + $0x8] sm:$0xff] %v1968_v6  ;;  %v1972_v22 = vmul.f32 %v1915_v7, %v1876_v43 }
 0x6b1   : > { %v1910_v3 = vpop.permute.xlu0 %1909 }
 0x6b2   : > { %v1971_v25 = vmul.f32 %v1910_v3, %v1875_v52  ;;  %1988 = vst [vmem:[%s3790_s8 + $0x28] sm:$0xff] %v1972_v22 }
 0x6b3   : > { %v1925_v13 = vpop.permute.xlu1 %1924 }
 0x6b4   : > { %1987 = vst [vmem:[%s3790_s8 + $0x20] sm:$0xff] %v1971_v25  ;;  %v1974_v58 = vmul.f32 %v1925_v13, %v1878_v56 }
 0x6b5   : > { %v1920_v9 = vpop.permute.xlu0 %1919 }
 0x6b6   : > { %v1973_v45 = vmul.f32 %v1920_v9, %v1877_v29  ;;  %1990 = vst [vmem:[%s3790_s8 + $0x38] sm:$0xff] %v1974_v58 }
 0x6b7   : > { %v1935_v27 = vpop.permute.xlu1 %1934 }
 0x6b8   : > { %1989 = vst [vmem:[%s3790_s8 + $0x30] sm:$0xff] %v1973_v45  ;;  %v1976_v61 = vmul.f32 %v1935_v27, %v1880_v5 }
 0x6b9   : > { %v1930_v48 = vpop.permute.xlu0 %1929 }
 0x6ba   : > { %v1975_v15 = vmul.f32 %v1930_v48, %v1879_v12  ;;  %1992 = vst [vmem:[%s3790_s8 + $0x48] sm:$0xff] %v1976_v61 }
 0x6bb   : > { %v1945_v41 = vpop.permute.xlu1 %1944 }
 0x6bc   : > { %1991 = vst [vmem:[%s3790_s8 + $0x40] sm:$0xff] %v1975_v15  ;;  %v1978_v31 = vmul.f32 %v1945_v41, %v1882_v39 }
 0x6bd   : > { %v1940_v16 = vpop.permute.xlu0 %1939 }
 0x6be   : > { %v1977_v37 = vmul.f32 %v1940_v16, %v1881_v14  ;;  %1994 = vst [vmem:[%s3790_s8 + $0x58] sm:$0xff] %v1978_v31 }
 0x6bf   : > { %v1955_v21 = vpop.permute.xlu1 %1954 }
 0x6c0   : > { %1993 = vst [vmem:[%s3790_s8 + $0x50] sm:$0xff] %v1977_v37  ;;  %v1980_v28 = vmul.f32 %v1955_v21, %v1884_v51 }
 0x6c1   : > { %v1950_v49 = vpop.permute.xlu0 %1949 }
 0x6c2   : > { %v1979_v19 = vmul.f32 %v1950_v49, %v1883_v17  ;;  %1996 = vst [vmem:[%s3790_s8 + $0x68] sm:$0xff] %v1980_v28 }
 0x6c3   : > { %v1965_v35 = vpop.permute.xlu1 %1964 }
 0x6c4   : > { %1995 = vst [vmem:[%s3790_s8 + $0x60] sm:$0xff] %v1979_v19  ;;  %v1982_v60 = vmul.f32 %v1965_v35, %v1886_v30 }
 0x6c5   : > { %v1960_v57 = vpop.permute.xlu0 %1959 }
 0x6c6   : > { %v1981_v42 = vmul.f32 %v1960_v57, %v1885_v33  ;;  %1998 = vst [vmem:[%s3790_s8 + $0x78] sm:$0xff] %v1982_v60 }
 0x6c8   : > { %1997 = vst [vmem:[%s3790_s8 + $0x70] sm:$0xff] %v1981_v42 }
 0x6c9 PF: > { %s4427_s26 = sld [smem:[#allocation25_spill]]  ;;  %s4428_s24 = sld [smem:[#allocation26_spill]] }
 0x6ca   : > { %s2015_s10 = sshll.u32 %s3790_s8, 4  ;;  %s4430_s18 = sld [smem:[#allocation37_spill]]  ;;  %s4271_s10 = int_to_ptr.vmem [resolvable:$true] %s2015_s10 }
 0x6cb   : > { %s2000_s3 = scalar_lea.sflag [#allocation10], %s3764_s5  ;;  %s3228_s28 = scalar_lea.vmem %s4271_s10, 2048 }
 0x6cc   : > { %p3229_p6 = scmp.ne.s32.totalorder %s4271_s10, %s3228_s28  ;;  %s3391_s13 = smov [#allocation17]  }
 0x6cd   : > { %s3232_s8 = sshll.u32 %s3391_s13, 4  ;;  %s3233_s8 = int_to_ptr.vmem [resolvable:$false] %s3232_s8 }
 0x6ce   : > { %p3230_p12 = pnand %p3229_p6, %p3632_p5  ;;  %s3234_s16 = scalar_lea.vmem %s3233_s8, 4096 }
 0x6cf   : > { %s2201_s2 = sshll.u32 %s4427_s26, 4  ;;  %s2202_s17 = sshll.u32 %s4428_s24, 5 }
 0x6d0   : > { %s2012_s21 = sadd.s32 %s2202_s17, %s2201_s2  ;;  %s4431_s12 = smov %s4430_s18 }
 0x6d1   : > { %s2203_s14 = sshll.u32 %s2012_s21, 7  ;;  %p3231_p8 = pneg %p3230_p12 }
 0x6d2   : > { %s4276_s15 = scalar_lea.hbm %s4430_s18, %s2203_s14  ;;  %p3235_p11 = scmp.lt.s32.totalorder %s4271_s10, %s3233_s8 }
 0x6d3   : > { %p3236_p4 = scmp.lt.s32.totalorder %s3234_s16, %s3228_s28 }
 0x6d5   : > { %p3237_p10 = por %p3236_p4, %p3235_p11 }
 0x6d7   : > { %p3238_p0 = pnand %p3237_p10, %p3231_p8 }
 0x6d9   : > { %3241 = shalt.err (!%p3238_p0)
}
 0x6da   : > { %s3242_s26 = scalar_lea.hbm %s4276_s15, 2048  ;;  %s3246_s17 = scalar_lea.hbm %s4431_s12, 8192 }
 0x6db   : > { %p3243_p7 = scmp.ne.s32.totalorder %s4276_s15, %s3242_s26  ;;  %p3247_p2 = scmp.lt.u32.totalorder %s4276_s15, %s4431_s12 }
 0x6dc   : > { %p3248_p9 = scmp.lt.u32.totalorder %s3246_s17, %s3242_s26  ;;  %p3250_p6 = scmp.lt.u32.totalorder %s3242_s26, %s4276_s15 }
 0x6dd   : > { %p3244_p13 = pnand %p3243_p7, %p3632_p5 }
 0x6de   : > { %p3249_p1 = por %p3248_p9, %p3247_p2 }
 0x6df   : > { %p3245_p3 = pneg %p3244_p13 }
 0x6e0   : > { %p3251_p12 = por %p3250_p6, %p3249_p1 }
 0x6e2   : > { %p3252_p8 = pnand %p3251_p12, %p3245_p3 }
 0x6e4   : > { %3255 = shalt.err (!%p3252_p8)
}
 0x6e5   : > { %s3392_s6 = smov 128   ;;  %s3393_s7 = smov 8  }
 0x6e6   : > { %2838 = dma.vmem_to_hbm [thread:$0]  (%p3632_p5), %s4271_s10, 2048, %s4276_s15, %s2000_s3, %s3392_s6, %s3392_s6, %s3393_s7  }
 0x6e7 PF: > { %s4432_s18 = sld [smem:[#allocation23_spill]]  ;;  %s4433_s28 = sld [smem:[#allocation30_spill]] }
 0x6e8   : > { %p2868_p11 = scmp.ge.s32.totalorder %s3378_s30, 2 }
 0x6ed   : > { %s2030_s13 = sand.u32 1, %s4432_s18   ;;  %p4434_p4 = scmp.ne.s32.totalorder %s4433_s28, 0 }
 0x6ee   : > { %s2031_s8 = scalar_lea.sflag [#allocation10], %s2030_s13 }
 0x6ef   : > { %p2858_p10 = pnand %p2868_p11, %p4434_p4 }
 0x6f1   : > { %3325 = dma.done.wait (!%p2858_p10), %s2031_s8, 2048  }
 0x6f2   : > { %3327 = vsyncadd (!%p2858_p10), %s2031_s8, 4294965248  ;;  %s25_s30 = sadd.s32 1, %s3378_s30   ;;  %s4436_s5 = sld [smem:[#allocation27_spill]] }
 0x6f3   : > { %p4307_p0 = scmp.ge.s32.totalorder %s25_s30, 10   ;;  %s4437_s11 = sld [smem:[#allocation31_spill]] }
 0x6f4   : > { %s4438_s28 = sld [smem:[#allocation33_spill]]  ;;  %s4439_s10 = smov %s4460_s25 }
 0x6f5   : > { %s4440_s18 = smov %s3334_s19  ;;  %s4441_s19 = smov %s3338_s20 }
 0x6f6   : > { %s4442_s20 = smov %s3709_s9  ;;  %s4443_s21 = smov %s3346_s22 }
 0x6f7   : > { %s4444_s22 = smov %s3350_s23  ;;  %s4445_s23 = smov %s3653_s4 }
 0x6f8   : > { %s4446_s24 = smov %s3366_s27  ;;  %s4447_s25 = smov %s4436_s5 }
 0x6f9   : > { %s4448_s26 = smov %s3374_s29  ;;  %s4449_s27 = smov %s4437_s11 }
 0x6fa   : > { %s4450_s29 = smov %s4439_s10  ;;  %24 = sbr.rel (!%p4307_p0) target bundleno = 18 (0x12), region = 126 }
 0x701   :  { %2036 = vsyncpa [#allocation9], 1 }
 0x702   :  { %2038 = vsyncpa [#allocation9 + $0x1], 1 }
 0x703   :  { %2039 = vsyncpa [#allocation12], 1 }
 0x704   :  { %2041 = vsyncpa [#allocation12 + $0x1], 1 }
 0x705   :  { %2042 = vsyncpa [#allocation15], 1 }
 0x706   :  { %2043 = vsyncpa [#allocation10], 1 }
 0x707   :  { %2045 = vsyncpa [#allocation10 + $0x1], 1 }

</bundles_post_ra>
